<compile_context>
chip_gen: v7x
topology: tpu7x:2x2x1
jax: 0.10.0
libtpu: 0.0.40
codegen_flags: <defaults>
</compile_context>

<pallas_src>
import functools
import math

import jax
import jax.numpy as jnp
import numpy as np
from jax.experimental import pallas as pl
from jax.experimental.pallas import tpu as pltpu

ALPHA = 0.01          # LeakyReLU slope
EPS = 1e-5            # InstanceNorm eps (PyTorch default)
INV_SQRT2 = 1.0 / math.sqrt(2.0)


def _round_up(x, m):
    return (x + m - 1) // m * m


def _in_lrelu(t, gamma, beta):
    """Two-pass InstanceNorm (biased var) + LeakyReLU over the last axis of (C, HW)."""
    n = t.shape[-1]
    mean = jnp.sum(t, axis=-1, keepdims=True) * (1.0 / n)
    d = t - mean
    var = jnp.sum(d * d, axis=-1, keepdims=True) * (1.0 / n)
    y = d * jax.lax.rsqrt(var + EPS) * gamma + beta
    return jnp.where(y > 0, y, ALPHA * y)


def resblk_kernel(x_ref, mask_ref, w1_ref, w2sc_ref,
                  g1_ref, b1_ref, g2_ref, b2_ref, bias2_ref,
                  out_ref, act_ref, patch_ref,
                  *, width, cin, cp, b_tile, pad):
    """Fused ResBlk5_3 forward for B_TILE samples per grid step.

    x_ref:     (B, Cin, HW)          f32 input, channel-first, flat spatial
    mask_ref:  (9, CP, HW)           f32 boundary masks, pre-broadcast to CP rows
    w1_ref:    (Cin, 10*CP)          bf16 conv1 im2col weight (last block zero)
    w2sc_ref:  (Cout, 10*CP)         bf16 [conv2 im2col | 1x1-shortcut] weight
    g*,b*:     (Cin, 1)              f32 InstanceNorm affine params
    bias2_ref: (Cout, 1)             f32 conv2 bias
    out_ref:   (B, Cout, HW)         f32
    act_ref:   (CP, 2*pad + HW)      f32 scratch: zero-framed activation window
    patch_ref: (10*CP, B*HW)         bf16 scratch: 9 tap blocks + 1 raw-x block
    """
    HW = x_ref.shape[2]
    W = width
    # Flat-spatial offset of tap (ky, kx); tap 4 is the centre (offset 0).
    offs = [(ky - 1) * W + (kx - 1) for ky in range(3) for kx in range(3)]

    # One full zero of the window scratch per step: provides zero halos for the
    # shifted reads AND zero sublane-pad rows [cin, cp) feeding the patch.
    # Unconditional (cheap, 1 aligned store) so it is correct even if the grid
    # is split across cores.
    act_ref[...] = jnp.zeros(act_ref.shape, act_ref.dtype)

    g1 = g1_ref[...]; b1 = b1_ref[...]
    g2 = g2_ref[...]; b2 = b2_ref[...]

    def stage(rows_f32):
        # Lane-aligned store of one sample's (Cin, HW) rows into the window.
        act_ref[:cin, pad:pad + HW] = rows_f32

    def window(off):
        # (CP, HW) shifted read; out-of-window lanes / pad rows are zeros.
        return act_ref[:, pad + off: pad + off + HW]

    def write_taps(b):
        col0, col1 = b * HW, (b + 1) * HW
        for t in range(9):
            v = window(offs[t])
            if t != 4:                       # centre tap needs no boundary mask
                v = v * mask_ref[t]
            patch_ref[t * cp:(t + 1) * cp, col0:col1] = v.astype(jnp.bfloat16)

    # ---- phase 1: raw x -> shortcut block;  IN1 + lrelu -> conv1 tap blocks --
    for b in range(b_tile):
        xb = x_ref[b]                                          # (Cin, HW) f32
        stage(xb)
        patch_ref[9 * cp:10 * cp, b * HW:(b + 1) * HW] = (
            window(0).astype(jnp.bfloat16))                    # raw x for 1x1 sc
        stage(_in_lrelu(xb, g1, b1))
        write_taps(b)

    # conv1 (no bias): ONE matmul, K = 10*CP (shortcut block hits zero weights).
    r1 = jnp.dot(w1_ref[...], patch_ref[...],
                 preferred_element_type=jnp.float32)           # (Cin, B*HW)

    # ---- phase 2: IN2 + lrelu on conv1 output -> conv2 tap blocks ------------
    for b in range(b_tile):
        stage(_in_lrelu(r1[:, b * HW:(b + 1) * HW], g2, b2))
        write_taps(b)                                          # shortcut rows untouched

    # conv2 + learned 1x1 shortcut fused in ONE matmul, then bias and /sqrt(2).
    r2 = jnp.dot(w2sc_ref[...], patch_ref[...],
                 preferred_element_type=jnp.float32)           # (Cout, B*HW)
    r2 = (r2 + bias2_ref[...]) * INV_SQRT2

    for b in range(b_tile):
        out_ref[b] = r2[:, b * HW:(b + 1) * HW].astype(out_ref.dtype)


def _build_boundary_masks(H, W, CP):
    """(9, CP, H*W) 0/1 masks: tap (ky,kx) valid iff (h+ky-1, w+kx-1) in-bounds."""
    hw = np.arange(H * W)
    h, w = hw // W, hw % W
    masks = np.zeros((9, CP, H * W), np.float32)
    for t in range(9):
        ky, kx = divmod(t, 3)
        dy, dx = ky - 1, kx - 1
        valid = (h + dy >= 0) & (h + dy < H) & (w + dx >= 0) & (w + dx < W)
        masks[t] = valid.astype(np.float32)[None, :]
    return masks


def _const_spec(shape):
    zeros = (0,) * len(shape)
    return pl.BlockSpec(shape, lambda n, _z=zeros: _z)


def _pick_b_tile(n, max_tile=4):
    for t in range(min(n, max_tile), 0, -1):
        if n % t == 0:
            return t
    return 1


def resblk5_3_forward(x_nchw, params):
    """NCHW in -> NCHW out.  B_TILE samples per grid step."""
    wsc, g1, b1, w1, g2, b2, w2, bias2 = params
    N, Cin, H, W = x_nchw.shape
    Cout = w2.shape[-1]
    HW = H * W
    CP = _round_up(Cin, 8)                 # sublane-aligned tap-block height
    B_TILE = _pick_b_tile(N)
    PAD = max(128, _round_up(W + 1, 128))  # lane-aligned halo for the window scratch

    # NCHW -> (N, C, H*W): order-preserving reshape only.
    x_flat = x_nchw.reshape(N, Cin, HW).astype(jnp.float32)

    # conv1 weight -> (Cin, 10*CP) im2col matrix (zero-padded sublane columns,
    # plus a zero block facing the raw-x shortcut rows, which conv1 ignores).
    w1_r = jnp.pad(w1.reshape(9, Cin, Cin), ((0, 0), (0, CP - Cin), (0, 0)))
    w1_mat = jnp.transpose(w1_r, (2, 0, 1)).reshape(Cin, 9 * CP)
    w1_mat = jnp.pad(w1_mat, ((0, 0), (0, CP))).astype(jnp.bfloat16)

    # conv2 weight and 1x1 shortcut weight fused -> (Cout, 10*CP).
    w2_r = jnp.pad(w2.reshape(9, Cin, Cout), ((0, 0), (0, CP - Cin), (0, 0)))
    w2_mat = jnp.transpose(w2_r, (2, 0, 1)).reshape(Cout, 9 * CP)
    wsc_mat = jnp.transpose(jnp.pad(wsc, ((0, CP - Cin), (0, 0))))       # (Cout, CP)
    w2sc_mat = jnp.concatenate([w2_mat, wsc_mat], axis=1).astype(jnp.bfloat16)

    g1_k = g1.reshape(Cin, 1).astype(jnp.float32)
    b1_k = b1.reshape(Cin, 1).astype(jnp.float32)
    g2_k = g2.reshape(Cin, 1).astype(jnp.float32)
    b2_k = b2.reshape(Cin, 1).astype(jnp.float32)
    bias2_k = bias2.reshape(Cout, 1).astype(jnp.float32)
    masks = jnp.asarray(_build_boundary_masks(H, W, CP))                 # (9, CP, HW)

    kernel = functools.partial(resblk_kernel, width=W, cin=Cin, cp=CP,
                               b_tile=B_TILE, pad=PAD)

    out_flat = pl.pallas_call(
        kernel,
        out_shape=jax.ShapeDtypeStruct((N, Cout, HW), jnp.float32),
        grid=(N // B_TILE,),
        in_specs=[
            pl.BlockSpec((B_TILE, Cin, HW), lambda n: (n, 0, 0)),   # x
            _const_spec((9, CP, HW)),                               # boundary masks
            _const_spec((Cin, 10 * CP)),                            # conv1 (im2col)
            _const_spec((Cout, 10 * CP)),                           # conv2 | shortcut
            _const_spec((Cin, 1)), _const_spec((Cin, 1)),           # IN1 gamma, beta
            _const_spec((Cin, 1)), _const_spec((Cin, 1)),           # IN2 gamma, beta
            _const_spec((Cout, 1)),                                 # conv2 bias
        ],
        out_specs=pl.BlockSpec((B_TILE, Cout, HW), lambda n: (n, 0, 0)),
        scratch_shapes=[
            pltpu.VMEM((CP, 2 * PAD + HW), jnp.float32),            # window scratch
            pltpu.VMEM((10 * CP, B_TILE * HW), jnp.bfloat16),       # im2col patch
        ],
        compiler_params=pltpu.CompilerParams(
            # TODO(synk): use pltpu.CORE_PARALLEL here to split the batch axis
            # across v7x's two TensorCores; kept "parallel" for portability.
            dimension_semantics=("parallel",),
            vmem_limit_bytes=32 * 1024 * 1024,
        ),
    )(x_flat, masks, w1_mat, w2sc_mat, g1_k, b1_k, g2_k, b2_k, bias2_k)

    return out_flat.reshape(N, Cout, H, W)


def init_params(key, cin, cout):
    """Deterministic synthetic parameters (shapes mirror the nn.Module)."""
    ks = jax.random.split(key, 8)
    wsc = 0.1 * jax.random.normal(ks[0], (cin, cout), jnp.float32)       # conv1x1 (Ci,Co)
    w1 = 0.1 * jax.random.normal(ks[1], (3, 3, cin, cin), jnp.float32)   # conv1, HWIO
    w2 = 0.1 * jax.random.normal(ks[2], (3, 3, cin, cout), jnp.float32)  # conv2, HWIO
    bias2 = 0.1 * jax.random.normal(ks[3], (1, 1, 1, cout), jnp.float32)
    g1 = 1.0 + 0.1 * jax.random.normal(ks[4], (1, 1, 1, cin), jnp.float32)
    b1 = 0.1 * jax.random.normal(ks[5], (1, 1, 1, cin), jnp.float32)
    g2 = 1.0 + 0.1 * jax.random.normal(ks[6], (1, 1, 1, cin), jnp.float32)
    b2 = 0.1 * jax.random.normal(ks[7], (1, 1, 1, cin), jnp.float32)
    return wsc, g1, b1, w1, g2, b2, w2, bias2


def _instance_norm_nhwc(t, gamma, beta):
    mean = jnp.mean(t, axis=(1, 2), keepdims=True)
    var = jnp.mean((t - mean) ** 2, axis=(1, 2), keepdims=True)
    return (t - mean) * jax.lax.rsqrt(var + EPS) * gamma + beta


def ref_forward(x_nchw, params):
    """Pure-JAX reference (mirrors the PyTorch forward), HIGHEST precision."""
    wsc, g1, b1, w1, g2, b2, w2, bias2 = params
    x = jnp.transpose(x_nchw, (0, 2, 3, 1)).astype(jnp.float32)
    dn = ('NHWC', 'HWIO', 'NHWC')

    def conv(t, w):
        return jax.lax.conv_general_dilated(
            t, w, (1, 1), 'SAME', dimension_numbers=dn,
            precision=jax.lax.Precision.HIGHEST)

    def lrelu(t):
        return jnp.where(t > 0, t, ALPHA * t)

    sc = conv(x, wsc.reshape(1, 1, *wsc.shape))
    r = lrelu(_instance_norm_nhwc(x, g1, b1))
    r = conv(r, w1)
    r = lrelu(_instance_norm_nhwc(r, g2, b2))
    r = conv(r, w2) + bias2
    y = (sc + r) * INV_SQRT2
    return jnp.transpose(y, (0, 3, 1, 2))


if __name__ == "__main__":
    key = jax.random.PRNGKey(0)
    kx, kp = jax.random.split(key)

    N, Cin, Cout, H, W = 2, 4, 8, 16, 16          # dim_in != dim_out -> learned shortcut
    x = jax.random.normal(kx, (N, Cin, H, W), jnp.float32)   # NCHW like PyTorch
    params = init_params(kp, Cin, Cout)

    fwd = jax.jit(resblk5_3_forward)
    y = jax.block_until_ready(fwd(x, params))

    y_ref = ref_forward(x, params)
    assert y.shape == (N, Cout, H, W)
    # MXU operands are bf16 (same rounding as default-precision f32 matmuls),
    # so compare against the HIGHEST-precision reference at 1e-2.
    np.testing.assert_allclose(np.asarray(y), np.asarray(y_ref), atol=1e-2, rtol=1e-2)

    print("KERNEL_OK")
</pallas_src>

<mosaic_0001>
module attributes {stable_mosaic.version = 11 : i64} {
  func.func @resblk_kernel(%arg0: i32, %arg1: memref<2x4x256xf32, #tpu.memory_space<vmem>>, %arg2: memref<9x8x256xf32, #tpu.memory_space<vmem>>, %arg3: memref<4x80xbf16, #tpu.memory_space<vmem>>, %arg4: memref<8x80xbf16, #tpu.memory_space<vmem>>, %arg5: memref<4x1xf32, #tpu.memory_space<vmem>>, %arg6: memref<4x1xf32, #tpu.memory_space<vmem>>, %arg7: memref<4x1xf32, #tpu.memory_space<vmem>>, %arg8: memref<4x1xf32, #tpu.memory_space<vmem>>, %arg9: memref<8x1xf32, #tpu.memory_space<vmem>>, %arg10: memref<2x8x256xf32, #tpu.memory_space<vmem>>, %arg11: memref<8x512xf32, #tpu.memory_space<vmem>>, %arg12: memref<80x512xbf16, #tpu.memory_space<vmem>>) attributes {dimension_semantics = [#tpu.dimension_semantics<parallel>], iteration_bounds = array<i64: 1>, scalar_prefetch = 0 : i64, scratch_operands = 2 : i64, tpu.core_type = #tpu.core_type<tc>, window_params = [{transform_indices = @transform_0, window_bounds = array<i64: 2, 4, 256>}, {pipeline_mode = #tpu.pipeline_mode<synchronous>, transform_indices = @transform_1, window_bounds = array<i64: 9, 8, 256>}, {pipeline_mode = #tpu.pipeline_mode<synchronous>, transform_indices = @transform_2, window_bounds = array<i64: 4, 80>}, {pipeline_mode = #tpu.pipeline_mode<synchronous>, transform_indices = @transform_3, window_bounds = array<i64: 8, 80>}, {pipeline_mode = #tpu.pipeline_mode<synchronous>, transform_indices = @transform_4, window_bounds = array<i64: 4, 1>}, {pipeline_mode = #tpu.pipeline_mode<synchronous>, transform_indices = @transform_5, window_bounds = array<i64: 4, 1>}, {pipeline_mode = #tpu.pipeline_mode<synchronous>, transform_indices = @transform_6, window_bounds = array<i64: 4, 1>}, {pipeline_mode = #tpu.pipeline_mode<synchronous>, transform_indices = @transform_7, window_bounds = array<i64: 4, 1>}, {pipeline_mode = #tpu.pipeline_mode<synchronous>, transform_indices = @transform_8, window_bounds = array<i64: 8, 1>}, {transform_indices = @transform_9, window_bounds = array<i64: 2, 8, 256>}]} {
    %cst = arith.constant 0.000000e+00 : f32
    %0 = vector.broadcast %cst : f32 to vector<8x512xf32>
    %c0 = arith.constant 0 : index
    %c0_0 = arith.constant 0 : index
    %1 = vector.load %arg11[%c0, %c0_0] : memref<8x512xf32, #tpu.memory_space<vmem>>, vector<8x512xf32>
    tpu.vector_store %arg11[%c0, %c0_0], %0 {strides = array<i32>} : memref<8x512xf32, #tpu.memory_space<vmem>>, vector<8x512xf32>,
    %c0_1 = arith.constant 0 : index
    %c0_2 = arith.constant 0 : index
    %2 = vector.load %arg5[%c0_1, %c0_2] : memref<4x1xf32, #tpu.memory_space<vmem>>, vector<4x1xf32>
    %c0_3 = arith.constant 0 : index
    %c0_4 = arith.constant 0 : index
    %3 = vector.load %arg6[%c0_3, %c0_4] : memref<4x1xf32, #tpu.memory_space<vmem>>, vector<4x1xf32>
    %c0_5 = arith.constant 0 : index
    %c0_6 = arith.constant 0 : index
    %4 = vector.load %arg7[%c0_5, %c0_6] : memref<4x1xf32, #tpu.memory_space<vmem>>, vector<4x1xf32>
    %c0_7 = arith.constant 0 : index
    %c0_8 = arith.constant 0 : index
    %5 = vector.load %arg8[%c0_7, %c0_8] : memref<4x1xf32, #tpu.memory_space<vmem>>, vector<4x1xf32>
    %c0_9 = arith.constant 0 : index
    %c0_10 = arith.constant 0 : index
    %c0_11 = arith.constant 0 : index
    %6 = vector.load %arg1[%c0_9, %c0_10, %c0_11] : memref<2x4x256xf32, #tpu.memory_space<vmem>>, vector<1x4x256xf32>
    %7 = vector.shape_cast %6 : vector<1x4x256xf32> to vector<4x256xf32>
    %c0_12 = arith.constant 0 : index
    %c128 = arith.constant 128 : index
    %8 = vector.load %arg11[%c0_12, %c128] : memref<8x512xf32, #tpu.memory_space<vmem>>, vector<4x256xf32>
    tpu.vector_store %arg11[%c0_12, %c128], %7 {strides = array<i32>} : memref<8x512xf32, #tpu.memory_space<vmem>>, vector<4x256xf32>,
    %c0_13 = arith.constant 0 : index
    %c128_14 = arith.constant 128 : index
    %9 = vector.load %arg11[%c0_13, %c128_14] : memref<8x512xf32, #tpu.memory_space<vmem>>, vector<8x256xf32>
    %10 = arith.truncf %9 : vector<8x256xf32> to vector<8x256xbf16>
    %c72 = arith.constant 72 : index
    %c0_15 = arith.constant 0 : index
    %11 = vector.load %arg12[%c72, %c0_15] : memref<80x512xbf16, #tpu.memory_space<vmem>>, vector<8x256xbf16>
    tpu.vector_store %arg12[%c72, %c0_15], %10 {strides = array<i32>} : memref<80x512xbf16, #tpu.memory_space<vmem>>, vector<8x256xbf16>,
    %cst_16 = arith.constant dense<0.000000e+00> : vector<4xf32>
    %12 = vector.multi_reduction <add>, %7, %cst_16 [1] : vector<4x256xf32> to vector<4xf32>
    %13 = vector.shape_cast %12 : vector<4xf32> to vector<4x1xf32>
    %cst_17 = arith.constant 3.906250e-03 : f32
    %14 = vector.broadcast %cst_17 : f32 to vector<4x1xf32>
    %15 = arith.mulf %13, %14 : vector<4x1xf32>
    %16 = vector.broadcast %15 : vector<4x1xf32> to vector<4x256xf32>
    %17 = arith.subf %7, %16 : vector<4x256xf32>
    %18 = arith.mulf %17, %17 : vector<4x256xf32>
    %cst_18 = arith.constant dense<0.000000e+00> : vector<4xf32>
    %19 = vector.multi_reduction <add>, %18, %cst_18 [1] : vector<4x256xf32> to vector<4xf32>
    %20 = vector.shape_cast %19 : vector<4xf32> to vector<4x1xf32>
    %cst_19 = arith.constant 3.906250e-03 : f32
    %21 = vector.broadcast %cst_19 : f32 to vector<4x1xf32>
    %22 = arith.mulf %20, %21 : vector<4x1xf32>
    %cst_20 = arith.constant 9.99999974E-6 : f32
    %23 = vector.broadcast %cst_20 : f32 to vector<4x1xf32>
    %24 = arith.addf %22, %23 : vector<4x1xf32>
    %25 = math.rsqrt %24 : vector<4x1xf32>
    %26 = vector.broadcast %25 : vector<4x1xf32> to vector<4x256xf32>
    %27 = arith.mulf %17, %26 : vector<4x256xf32>
    %28 = vector.broadcast %2 : vector<4x1xf32> to vector<4x256xf32>
    %29 = arith.mulf %27, %28 : vector<4x256xf32>
    %30 = vector.broadcast %3 : vector<4x1xf32> to vector<4x256xf32>
    %31 = arith.addf %29, %30 : vector<4x256xf32>
    %cst_21 = arith.constant 0.000000e+00 : f32
    %32 = vector.broadcast %cst_21 : f32 to vector<4x256xf32>
    %33 = arith.cmpf ogt, %31, %32 : vector<4x256xf32>
    %cst_22 = arith.constant 0.00999999977 : f32
    %34 = vector.broadcast %cst_22 : f32 to vector<4x256xf32>
    %35 = arith.mulf %34, %31 : vector<4x256xf32>
    %36 = arith.select %33, %31, %35 : vector<4x256xi1>, vector<4x256xf32>
    %c0_23 = arith.constant 0 : index
    %c128_24 = arith.constant 128 : index
    %37 = vector.load %arg11[%c0_23, %c128_24] : memref<8x512xf32, #tpu.memory_space<vmem>>, vector<4x256xf32>
    tpu.vector_store %arg11[%c0_23, %c128_24], %36 {strides = array<i32>} : memref<8x512xf32, #tpu.memory_space<vmem>>, vector<4x256xf32>,
    %c0_25 = arith.constant 0 : index
    %c111 = arith.constant 111 : index
    %38 = vector.load %arg11[%c0_25, %c111] : memref<8x512xf32, #tpu.memory_space<vmem>>, vector<8x256xf32>
    %c0_26 = arith.constant 0 : index
    %c0_27 = arith.constant 0 : index
    %c0_28 = arith.constant 0 : index
    %39 = vector.load %arg2[%c0_26, %c0_27, %c0_28] : memref<9x8x256xf32, #tpu.memory_space<vmem>>, vector<1x8x256xf32>
    %40 = vector.shape_cast %39 : vector<1x8x256xf32> to vector<8x256xf32>
    %41 = arith.mulf %38, %40 : vector<8x256xf32>
    %42 = arith.truncf %41 : vector<8x256xf32> to vector<8x256xbf16>
    %c0_29 = arith.constant 0 : index
    %c0_30 = arith.constant 0 : index
    %43 = vector.load %arg12[%c0_29, %c0_30] : memref<80x512xbf16, #tpu.memory_space<vmem>>, vector<8x256xbf16>
    tpu.vector_store %arg12[%c0_29, %c0_30], %42 {strides = array<i32>} : memref<80x512xbf16, #tpu.memory_space<vmem>>, vector<8x256xbf16>,
    %c0_31 = arith.constant 0 : index
    %c112 = arith.constant 112 : index
    %44 = vector.load %arg11[%c0_31, %c112] : memref<8x512xf32, #tpu.memory_space<vmem>>, vector<8x256xf32>
    %c1 = arith.constant 1 : index
    %c0_32 = arith.constant 0 : index
    %c0_33 = arith.constant 0 : index
    %45 = vector.load %arg2[%c1, %c0_32, %c0_33] : memref<9x8x256xf32, #tpu.memory_space<vmem>>, vector<1x8x256xf32>
    %46 = vector.shape_cast %45 : vector<1x8x256xf32> to vector<8x256xf32>
    %47 = arith.mulf %44, %46 : vector<8x256xf32>
    %48 = arith.truncf %47 : vector<8x256xf32> to vector<8x256xbf16>
    %c8 = arith.constant 8 : index
    %c0_34 = arith.constant 0 : index
    %49 = vector.load %arg12[%c8, %c0_34] : memref<80x512xbf16, #tpu.memory_space<vmem>>, vector<8x256xbf16>
    tpu.vector_store %arg12[%c8, %c0_34], %48 {strides = array<i32>} : memref<80x512xbf16, #tpu.memory_space<vmem>>, vector<8x256xbf16>,
    %c0_35 = arith.constant 0 : index
    %c113 = arith.constant 113 : index
    %50 = vector.load %arg11[%c0_35, %c113] : memref<8x512xf32, #tpu.memory_space<vmem>>, vector<8x256xf32>
    %c2 = arith.constant 2 : index
    %c0_36 = arith.constant 0 : index
    %c0_37 = arith.constant 0 : index
    %51 = vector.load %arg2[%c2, %c0_36, %c0_37] : memref<9x8x256xf32, #tpu.memory_space<vmem>>, vector<1x8x256xf32>
    %52 = vector.shape_cast %51 : vector<1x8x256xf32> to vector<8x256xf32>
    %53 = arith.mulf %50, %52 : vector<8x256xf32>
    %54 = arith.truncf %53 : vector<8x256xf32> to vector<8x256xbf16>
    %c16 = arith.constant 16 : index
    %c0_38 = arith.constant 0 : index
    %55 = vector.load %arg12[%c16, %c0_38] : memref<80x512xbf16, #tpu.memory_space<vmem>>, vector<8x256xbf16>
    tpu.vector_store %arg12[%c16, %c0_38], %54 {strides = array<i32>} : memref<80x512xbf16, #tpu.memory_space<vmem>>, vector<8x256xbf16>,
    %c0_39 = arith.constant 0 : index
    %c127 = arith.constant 127 : index
    %56 = vector.load %arg11[%c0_39, %c127] : memref<8x512xf32, #tpu.memory_space<vmem>>, vector<8x256xf32>
    %c3 = arith.constant 3 : index
    %c0_40 = arith.constant 0 : index
    %c0_41 = arith.constant 0 : index
    %57 = vector.load %arg2[%c3, %c0_40, %c0_41] : memref<9x8x256xf32, #tpu.memory_space<vmem>>, vector<1x8x256xf32>
    %58 = vector.shape_cast %57 : vector<1x8x256xf32> to vector<8x256xf32>
    %59 = arith.mulf %56, %58 : vector<8x256xf32>
    %60 = arith.truncf %59 : vector<8x256xf32> to vector<8x256xbf16>
    %c24 = arith.constant 24 : index
    %c0_42 = arith.constant 0 : index
    %61 = vector.load %arg12[%c24, %c0_42] : memref<80x512xbf16, #tpu.memory_space<vmem>>, vector<8x256xbf16>
    tpu.vector_store %arg12[%c24, %c0_42], %60 {strides = array<i32>} : memref<80x512xbf16, #tpu.memory_space<vmem>>, vector<8x256xbf16>,
    %c0_43 = arith.constant 0 : index
    %c128_44 = arith.constant 128 : index
    %62 = vector.load %arg11[%c0_43, %c128_44] : memref<8x512xf32, #tpu.memory_space<vmem>>, vector<8x256xf32>
    %63 = arith.truncf %62 : vector<8x256xf32> to vector<8x256xbf16>
    %c32 = arith.constant 32 : index
    %c0_45 = arith.constant 0 : index
    %64 = vector.load %arg12[%c32, %c0_45] : memref<80x512xbf16, #tpu.memory_space<vmem>>, vector<8x256xbf16>
    tpu.vector_store %arg12[%c32, %c0_45], %63 {strides = array<i32>} : memref<80x512xbf16, #tpu.memory_space<vmem>>, vector<8x256xbf16>,
    %c0_46 = arith.constant 0 : index
    %c129 = arith.constant 129 : index
    %65 = vector.load %arg11[%c0_46, %c129] : memref<8x512xf32, #tpu.memory_space<vmem>>, vector<8x256xf32>
    %c5 = arith.constant 5 : index
    %c0_47 = arith.constant 0 : index
    %c0_48 = arith.constant 0 : index
    %66 = vector.load %arg2[%c5, %c0_47, %c0_48] : memref<9x8x256xf32, #tpu.memory_space<vmem>>, vector<1x8x256xf32>
    %67 = vector.shape_cast %66 : vector<1x8x256xf32> to vector<8x256xf32>
    %68 = arith.mulf %65, %67 : vector<8x256xf32>
    %69 = arith.truncf %68 : vector<8x256xf32> to vector<8x256xbf16>
    %c40 = arith.constant 40 : index
    %c0_49 = arith.constant 0 : index
    %70 = vector.load %arg12[%c40, %c0_49] : memref<80x512xbf16, #tpu.memory_space<vmem>>, vector<8x256xbf16>
    tpu.vector_store %arg12[%c40, %c0_49], %69 {strides = array<i32>} : memref<80x512xbf16, #tpu.memory_space<vmem>>, vector<8x256xbf16>,
    %c0_50 = arith.constant 0 : index
    %c143 = arith.constant 143 : index
    %71 = vector.load %arg11[%c0_50, %c143] : memref<8x512xf32, #tpu.memory_space<vmem>>, vector<8x256xf32>
    %c6 = arith.constant 6 : index
    %c0_51 = arith.constant 0 : index
    %c0_52 = arith.constant 0 : index
    %72 = vector.load %arg2[%c6, %c0_51, %c0_52] : memref<9x8x256xf32, #tpu.memory_space<vmem>>, vector<1x8x256xf32>
    %73 = vector.shape_cast %72 : vector<1x8x256xf32> to vector<8x256xf32>
    %74 = arith.mulf %71, %73 : vector<8x256xf32>
    %75 = arith.truncf %74 : vector<8x256xf32> to vector<8x256xbf16>
    %c48 = arith.constant 48 : index
    %c0_53 = arith.constant 0 : index
    %76 = vector.load %arg12[%c48, %c0_53] : memref<80x512xbf16, #tpu.memory_space<vmem>>, vector<8x256xbf16>
    tpu.vector_store %arg12[%c48, %c0_53], %75 {strides = array<i32>} : memref<80x512xbf16, #tpu.memory_space<vmem>>, vector<8x256xbf16>,
    %c0_54 = arith.constant 0 : index
    %c144 = arith.constant 144 : index
    %77 = vector.load %arg11[%c0_54, %c144] : memref<8x512xf32, #tpu.memory_space<vmem>>, vector<8x256xf32>
    %c7 = arith.constant 7 : index
    %c0_55 = arith.constant 0 : index
    %c0_56 = arith.constant 0 : index
    %78 = vector.load %arg2[%c7, %c0_55, %c0_56] : memref<9x8x256xf32, #tpu.memory_space<vmem>>, vector<1x8x256xf32>
    %79 = vector.shape_cast %78 : vector<1x8x256xf32> to vector<8x256xf32>
    %80 = arith.mulf %77, %79 : vector<8x256xf32>
    %81 = arith.truncf %80 : vector<8x256xf32> to vector<8x256xbf16>
    %c56 = arith.constant 56 : index
    %c0_57 = arith.constant 0 : index
    %82 = vector.load %arg12[%c56, %c0_57] : memref<80x512xbf16, #tpu.memory_space<vmem>>, vector<8x256xbf16>
    tpu.vector_store %arg12[%c56, %c0_57], %81 {strides = array<i32>} : memref<80x512xbf16, #tpu.memory_space<vmem>>, vector<8x256xbf16>,
    %c0_58 = arith.constant 0 : index
    %c145 = arith.constant 145 : index
    %83 = vector.load %arg11[%c0_58, %c145] : memref<8x512xf32, #tpu.memory_space<vmem>>, vector<8x256xf32>
    %c8_59 = arith.constant 8 : index
    %c0_60 = arith.constant 0 : index
    %c0_61 = arith.constant 0 : index
    %84 = vector.load %arg2[%c8_59, %c0_60, %c0_61] : memref<9x8x256xf32, #tpu.memory_space<vmem>>, vector<1x8x256xf32>
    %85 = vector.shape_cast %84 : vector<1x8x256xf32> to vector<8x256xf32>
    %86 = arith.mulf %83, %85 : vector<8x256xf32>
    %87 = arith.truncf %86 : vector<8x256xf32> to vector<8x256xbf16>
    %c64 = arith.constant 64 : index
    %c0_62 = arith.constant 0 : index
    %88 = vector.load %arg12[%c64, %c0_62] : memref<80x512xbf16, #tpu.memory_space<vmem>>, vector<8x256xbf16>
    tpu.vector_store %arg12[%c64, %c0_62], %87 {strides = array<i32>} : memref<80x512xbf16, #tpu.memory_space<vmem>>, vector<8x256xbf16>,
    %c1_63 = arith.constant 1 : index
    %c0_64 = arith.constant 0 : index
    %c0_65 = arith.constant 0 : index
    %89 = vector.load %arg1[%c1_63, %c0_64, %c0_65] : memref<2x4x256xf32, #tpu.memory_space<vmem>>, vector<1x4x256xf32>
    %90 = vector.shape_cast %89 : vector<1x4x256xf32> to vector<4x256xf32>
    %c0_66 = arith.constant 0 : index
    %c128_67 = arith.constant 128 : index
    %91 = vector.load %arg11[%c0_66, %c128_67] : memref<8x512xf32, #tpu.memory_space<vmem>>, vector<4x256xf32>
    tpu.vector_store %arg11[%c0_66, %c128_67], %90 {strides = array<i32>} : memref<8x512xf32, #tpu.memory_space<vmem>>, vector<4x256xf32>,
    %c0_68 = arith.constant 0 : index
    %c128_69 = arith.constant 128 : index
    %92 = vector.load %arg11[%c0_68, %c128_69] : memref<8x512xf32, #tpu.memory_space<vmem>>, vector<8x256xf32>
    %93 = arith.truncf %92 : vector<8x256xf32> to vector<8x256xbf16>
    %c72_70 = arith.constant 72 : index
    %c256 = arith.constant 256 : index
    %94 = vector.load %arg12[%c72_70, %c256] : memref<80x512xbf16, #tpu.memory_space<vmem>>, vector<8x256xbf16>
    tpu.vector_store %arg12[%c72_70, %c256], %93 {strides = array<i32>} : memref<80x512xbf16, #tpu.memory_space<vmem>>, vector<8x256xbf16>,
    %cst_71 = arith.constant dense<0.000000e+00> : vector<4xf32>
    %95 = vector.multi_reduction <add>, %90, %cst_71 [1] : vector<4x256xf32> to vector<4xf32>
    %96 = vector.shape_cast %95 : vector<4xf32> to vector<4x1xf32>
    %cst_72 = arith.constant 3.906250e-03 : f32
    %97 = vector.broadcast %cst_72 : f32 to vector<4x1xf32>
    %98 = arith.mulf %96, %97 : vector<4x1xf32>
    %99 = vector.broadcast %98 : vector<4x1xf32> to vector<4x256xf32>
    %100 = arith.subf %90, %99 : vector<4x256xf32>
    %101 = arith.mulf %100, %100 : vector<4x256xf32>
    %cst_73 = arith.constant dense<0.000000e+00> : vector<4xf32>
    %102 = vector.multi_reduction <add>, %101, %cst_73 [1] : vector<4x256xf32> to vector<4xf32>
    %103 = vector.shape_cast %102 : vector<4xf32> to vector<4x1xf32>
    %cst_74 = arith.constant 3.906250e-03 : f32
    %104 = vector.broadcast %cst_74 : f32 to vector<4x1xf32>
    %105 = arith.mulf %103, %104 : vector<4x1xf32>
    %cst_75 = arith.constant 9.99999974E-6 : f32
    %106 = vector.broadcast %cst_75 : f32 to vector<4x1xf32>
    %107 = arith.addf %105, %106 : vector<4x1xf32>
    %108 = math.rsqrt %107 : vector<4x1xf32>
    %109 = vector.broadcast %108 : vector<4x1xf32> to vector<4x256xf32>
    %110 = arith.mulf %100, %109 : vector<4x256xf32>
    %111 = vector.broadcast %2 : vector<4x1xf32> to vector<4x256xf32>
    %112 = arith.mulf %110, %111 : vector<4x256xf32>
    %113 = vector.broadcast %3 : vector<4x1xf32> to vector<4x256xf32>
    %114 = arith.addf %112, %113 : vector<4x256xf32>
    %cst_76 = arith.constant 0.000000e+00 : f32
    %115 = vector.broadcast %cst_76 : f32 to vector<4x256xf32>
    %116 = arith.cmpf ogt, %114, %115 : vector<4x256xf32>
    %cst_77 = arith.constant 0.00999999977 : f32
    %117 = vector.broadcast %cst_77 : f32 to vector<4x256xf32>
    %118 = arith.mulf %117, %114 : vector<4x256xf32>
    %119 = arith.select %116, %114, %118 : vector<4x256xi1>, vector<4x256xf32>
    %c0_78 = arith.constant 0 : index
    %c128_79 = arith.constant 128 : index
    %120 = vector.load %arg11[%c0_78, %c128_79] : memref<8x512xf32, #tpu.memory_space<vmem>>, vector<4x256xf32>
    tpu.vector_store %arg11[%c0_78, %c128_79], %119 {strides = array<i32>} : memref<8x512xf32, #tpu.memory_space<vmem>>, vector<4x256xf32>,
    %c0_80 = arith.constant 0 : index
    %c111_81 = arith.constant 111 : index
    %121 = vector.load %arg11[%c0_80, %c111_81] : memref<8x512xf32, #tpu.memory_space<vmem>>, vector<8x256xf32>
    %c0_82 = arith.constant 0 : index
    %c0_83 = arith.constant 0 : index
    %c0_84 = arith.constant 0 : index
    %122 = vector.load %arg2[%c0_82, %c0_83, %c0_84] : memref<9x8x256xf32, #tpu.memory_space<vmem>>, vector<1x8x256xf32>
    %123 = vector.shape_cast %122 : vector<1x8x256xf32> to vector<8x256xf32>
    %124 = arith.mulf %121, %123 : vector<8x256xf32>
    %125 = arith.truncf %124 : vector<8x256xf32> to vector<8x256xbf16>
    %c0_85 = arith.constant 0 : index
    %c256_86 = arith.constant 256 : index
    %126 = vector.load %arg12[%c0_85, %c256_86] : memref<80x512xbf16, #tpu.memory_space<vmem>>, vector<8x256xbf16>
    tpu.vector_store %arg12[%c0_85, %c256_86], %125 {strides = array<i32>} : memref<80x512xbf16, #tpu.memory_space<vmem>>, vector<8x256xbf16>,
    %c0_87 = arith.constant 0 : index
    %c112_88 = arith.constant 112 : index
    %127 = vector.load %arg11[%c0_87, %c112_88] : memref<8x512xf32, #tpu.memory_space<vmem>>, vector<8x256xf32>
    %c1_89 = arith.constant 1 : index
    %c0_90 = arith.constant 0 : index
    %c0_91 = arith.constant 0 : index
    %128 = vector.load %arg2[%c1_89, %c0_90, %c0_91] : memref<9x8x256xf32, #tpu.memory_space<vmem>>, vector<1x8x256xf32>
    %129 = vector.shape_cast %128 : vector<1x8x256xf32> to vector<8x256xf32>
    %130 = arith.mulf %127, %129 : vector<8x256xf32>
    %131 = arith.truncf %130 : vector<8x256xf32> to vector<8x256xbf16>
    %c8_92 = arith.constant 8 : index
    %c256_93 = arith.constant 256 : index
    %132 = vector.load %arg12[%c8_92, %c256_93] : memref<80x512xbf16, #tpu.memory_space<vmem>>, vector<8x256xbf16>
    tpu.vector_store %arg12[%c8_92, %c256_93], %131 {strides = array<i32>} : memref<80x512xbf16, #tpu.memory_space<vmem>>, vector<8x256xbf16>,
    %c0_94 = arith.constant 0 : index
    %c113_95 = arith.constant 113 : index
    %133 = vector.load %arg11[%c0_94, %c113_95] : memref<8x512xf32, #tpu.memory_space<vmem>>, vector<8x256xf32>
    %c2_96 = arith.constant 2 : index
    %c0_97 = arith.constant 0 : index
    %c0_98 = arith.constant 0 : index
    %134 = vector.load %arg2[%c2_96, %c0_97, %c0_98] : memref<9x8x256xf32, #tpu.memory_space<vmem>>, vector<1x8x256xf32>
    %135 = vector.shape_cast %134 : vector<1x8x256xf32> to vector<8x256xf32>
    %136 = arith.mulf %133, %135 : vector<8x256xf32>
    %137 = arith.truncf %136 : vector<8x256xf32> to vector<8x256xbf16>
    %c16_99 = arith.constant 16 : index
    %c256_100 = arith.constant 256 : index
    %138 = vector.load %arg12[%c16_99, %c256_100] : memref<80x512xbf16, #tpu.memory_space<vmem>>, vector<8x256xbf16>
    tpu.vector_store %arg12[%c16_99, %c256_100], %137 {strides = array<i32>} : memref<80x512xbf16, #tpu.memory_space<vmem>>, vector<8x256xbf16>,
    %c0_101 = arith.constant 0 : index
    %c127_102 = arith.constant 127 : index
    %139 = vector.load %arg11[%c0_101, %c127_102] : memref<8x512xf32, #tpu.memory_space<vmem>>, vector<8x256xf32>
    %c3_103 = arith.constant 3 : index
    %c0_104 = arith.constant 0 : index
    %c0_105 = arith.constant 0 : index
    %140 = vector.load %arg2[%c3_103, %c0_104, %c0_105] : memref<9x8x256xf32, #tpu.memory_space<vmem>>, vector<1x8x256xf32>
    %141 = vector.shape_cast %140 : vector<1x8x256xf32> to vector<8x256xf32>
    %142 = arith.mulf %139, %141 : vector<8x256xf32>
    %143 = arith.truncf %142 : vector<8x256xf32> to vector<8x256xbf16>
    %c24_106 = arith.constant 24 : index
    %c256_107 = arith.constant 256 : index
    %144 = vector.load %arg12[%c24_106, %c256_107] : memref<80x512xbf16, #tpu.memory_space<vmem>>, vector<8x256xbf16>
    tpu.vector_store %arg12[%c24_106, %c256_107], %143 {strides = array<i32>} : memref<80x512xbf16, #tpu.memory_space<vmem>>, vector<8x256xbf16>,
    %c0_108 = arith.constant 0 : index
    %c128_109 = arith.constant 128 : index
    %145 = vector.load %arg11[%c0_108, %c128_109] : memref<8x512xf32, #tpu.memory_space<vmem>>, vector<8x256xf32>
    %146 = arith.truncf %145 : vector<8x256xf32> to vector<8x256xbf16>
    %c32_110 = arith.constant 32 : index
    %c256_111 = arith.constant 256 : index
    %147 = vector.load %arg12[%c32_110, %c256_111] : memref<80x512xbf16, #tpu.memory_space<vmem>>, vector<8x256xbf16>
    tpu.vector_store %arg12[%c32_110, %c256_111], %146 {strides = array<i32>} : memref<80x512xbf16, #tpu.memory_space<vmem>>, vector<8x256xbf16>,
    %c0_112 = arith.constant 0 : index
    %c129_113 = arith.constant 129 : index
    %148 = vector.load %arg11[%c0_112, %c129_113] : memref<8x512xf32, #tpu.memory_space<vmem>>, vector<8x256xf32>
    %c5_114 = arith.constant 5 : index
    %c0_115 = arith.constant 0 : index
    %c0_116 = arith.constant 0 : index
    %149 = vector.load %arg2[%c5_114, %c0_115, %c0_116] : memref<9x8x256xf32, #tpu.memory_space<vmem>>, vector<1x8x256xf32>
    %150 = vector.shape_cast %149 : vector<1x8x256xf32> to vector<8x256xf32>
    %151 = arith.mulf %148, %150 : vector<8x256xf32>
    %152 = arith.truncf %151 : vector<8x256xf32> to vector<8x256xbf16>
    %c40_117 = arith.constant 40 : index
    %c256_118 = arith.constant 256 : index
    %153 = vector.load %arg12[%c40_117, %c256_118] : memref<80x512xbf16, #tpu.memory_space<vmem>>, vector<8x256xbf16>
    tpu.vector_store %arg12[%c40_117, %c256_118], %152 {strides = array<i32>} : memref<80x512xbf16, #tpu.memory_space<vmem>>, vector<8x256xbf16>,
    %c0_119 = arith.constant 0 : index
    %c143_120 = arith.constant 143 : index
    %154 = vector.load %arg11[%c0_119, %c143_120] : memref<8x512xf32, #tpu.memory_space<vmem>>, vector<8x256xf32>
    %c6_121 = arith.constant 6 : index
    %c0_122 = arith.constant 0 : index
    %c0_123 = arith.constant 0 : index
    %155 = vector.load %arg2[%c6_121, %c0_122, %c0_123] : memref<9x8x256xf32, #tpu.memory_space<vmem>>, vector<1x8x256xf32>
    %156 = vector.shape_cast %155 : vector<1x8x256xf32> to vector<8x256xf32>
    %157 = arith.mulf %154, %156 : vector<8x256xf32>
    %158 = arith.truncf %157 : vector<8x256xf32> to vector<8x256xbf16>
    %c48_124 = arith.constant 48 : index
    %c256_125 = arith.constant 256 : index
    %159 = vector.load %arg12[%c48_124, %c256_125] : memref<80x512xbf16, #tpu.memory_space<vmem>>, vector<8x256xbf16>
    tpu.vector_store %arg12[%c48_124, %c256_125], %158 {strides = array<i32>} : memref<80x512xbf16, #tpu.memory_space<vmem>>, vector<8x256xbf16>,
    %c0_126 = arith.constant 0 : index
    %c144_127 = arith.constant 144 : index
    %160 = vector.load %arg11[%c0_126, %c144_127] : memref<8x512xf32, #tpu.memory_space<vmem>>, vector<8x256xf32>
    %c7_128 = arith.constant 7 : index
    %c0_129 = arith.constant 0 : index
    %c0_130 = arith.constant 0 : index
    %161 = vector.load %arg2[%c7_128, %c0_129, %c0_130] : memref<9x8x256xf32, #tpu.memory_space<vmem>>, vector<1x8x256xf32>
    %162 = vector.shape_cast %161 : vector<1x8x256xf32> to vector<8x256xf32>
    %163 = arith.mulf %160, %162 : vector<8x256xf32>
    %164 = arith.truncf %163 : vector<8x256xf32> to vector<8x256xbf16>
    %c56_131 = arith.constant 56 : index
    %c256_132 = arith.constant 256 : index
    %165 = vector.load %arg12[%c56_131, %c256_132] : memref<80x512xbf16, #tpu.memory_space<vmem>>, vector<8x256xbf16>
    tpu.vector_store %arg12[%c56_131, %c256_132], %164 {strides = array<i32>} : memref<80x512xbf16, #tpu.memory_space<vmem>>, vector<8x256xbf16>,
    %c0_133 = arith.constant 0 : index
    %c145_134 = arith.constant 145 : index
    %166 = vector.load %arg11[%c0_133, %c145_134] : memref<8x512xf32, #tpu.memory_space<vmem>>, vector<8x256xf32>
    %c8_135 = arith.constant 8 : index
    %c0_136 = arith.constant 0 : index
    %c0_137 = arith.constant 0 : index
    %167 = vector.load %arg2[%c8_135, %c0_136, %c0_137] : memref<9x8x256xf32, #tpu.memory_space<vmem>>, vector<1x8x256xf32>
    %168 = vector.shape_cast %167 : vector<1x8x256xf32> to vector<8x256xf32>
    %169 = arith.mulf %166, %168 : vector<8x256xf32>
    %170 = arith.truncf %169 : vector<8x256xf32> to vector<8x256xbf16>
    %c64_138 = arith.constant 64 : index
    %c256_139 = arith.constant 256 : index
    %171 = vector.load %arg12[%c64_138, %c256_139] : memref<80x512xbf16, #tpu.memory_space<vmem>>, vector<8x256xbf16>
    tpu.vector_store %arg12[%c64_138, %c256_139], %170 {strides = array<i32>} : memref<80x512xbf16, #tpu.memory_space<vmem>>, vector<8x256xbf16>,
    %c0_140 = arith.constant 0 : index
    %c0_141 = arith.constant 0 : index
    %172 = vector.load %arg3[%c0_140, %c0_141] : memref<4x80xbf16, #tpu.memory_space<vmem>>, vector<4x80xbf16>
    %c0_142 = arith.constant 0 : index
    %c0_143 = arith.constant 0 : index
    %173 = vector.load %arg12[%c0_142, %c0_143] : memref<80x512xbf16, #tpu.memory_space<vmem>>, vector<80x512xbf16>
    %cst_144 = arith.constant dense<0.000000e+00> : vector<4x512xf32>
    %174 = tpu.matmul %172, %173, %cst_144 {dimension_numbers = #tpu.dot_dimension_numbers<[1], [0], [0], [1], [0, 0, 1, 1], [], []>} : vector<4x80xbf16>, vector<80x512xbf16>, vector<4x512xf32> -> vector<4x512xf32>
    %175 = vector.extract_strided_slice %174 {offsets = [0, 0], sizes = [4, 256], strides = [1, 1]} : vector<4x512xf32> to vector<4x256xf32>
    %cst_145 = arith.constant dense<0.000000e+00> : vector<4xf32>
    %176 = vector.multi_reduction <add>, %175, %cst_145 [1] : vector<4x256xf32> to vector<4xf32>
    %177 = vector.shape_cast %176 : vector<4xf32> to vector<4x1xf32>
    %cst_146 = arith.constant 3.906250e-03 : f32
    %178 = vector.broadcast %cst_146 : f32 to vector<4x1xf32>
    %179 = arith.mulf %177, %178 : vector<4x1xf32>
    %180 = vector.broadcast %179 : vector<4x1xf32> to vector<4x256xf32>
    %181 = arith.subf %175, %180 : vector<4x256xf32>
    %182 = arith.mulf %181, %181 : vector<4x256xf32>
    %cst_147 = arith.constant dense<0.000000e+00> : vector<4xf32>
    %183 = vector.multi_reduction <add>, %182, %cst_147 [1] : vector<4x256xf32> to vector<4xf32>
    %184 = vector.shape_cast %183 : vector<4xf32> to vector<4x1xf32>
    %cst_148 = arith.constant 3.906250e-03 : f32
    %185 = vector.broadcast %cst_148 : f32 to vector<4x1xf32>
    %186 = arith.mulf %184, %185 : vector<4x1xf32>
    %cst_149 = arith.constant 9.99999974E-6 : f32
    %187 = vector.broadcast %cst_149 : f32 to vector<4x1xf32>
    %188 = arith.addf %186, %187 : vector<4x1xf32>
    %189 = math.rsqrt %188 : vector<4x1xf32>
    %190 = vector.broadcast %189 : vector<4x1xf32> to vector<4x256xf32>
    %191 = arith.mulf %181, %190 : vector<4x256xf32>
    %192 = vector.broadcast %4 : vector<4x1xf32> to vector<4x256xf32>
    %193 = arith.mulf %191, %192 : vector<4x256xf32>
    %194 = vector.broadcast %5 : vector<4x1xf32> to vector<4x256xf32>
    %195 = arith.addf %193, %194 : vector<4x256xf32>
    %cst_150 = arith.constant 0.000000e+00 : f32
    %196 = vector.broadcast %cst_150 : f32 to vector<4x256xf32>
    %197 = arith.cmpf ogt, %195, %196 : vector<4x256xf32>
    %cst_151 = arith.constant 0.00999999977 : f32
    %198 = vector.broadcast %cst_151 : f32 to vector<4x256xf32>
    %199 = arith.mulf %198, %195 : vector<4x256xf32>
    %200 = arith.select %197, %195, %199 : vector<4x256xi1>, vector<4x256xf32>
    %c0_152 = arith.constant 0 : index
    %c128_153 = arith.constant 128 : index
    %201 = vector.load %arg11[%c0_152, %c128_153] : memref<8x512xf32, #tpu.memory_space<vmem>>, vector<4x256xf32>
    tpu.vector_store %arg11[%c0_152, %c128_153], %200 {strides = array<i32>} : memref<8x512xf32, #tpu.memory_space<vmem>>, vector<4x256xf32>,
    %c0_154 = arith.constant 0 : index
    %c111_155 = arith.constant 111 : index
    %202 = vector.load %arg11[%c0_154, %c111_155] : memref<8x512xf32, #tpu.memory_space<vmem>>, vector<8x256xf32>
    %c0_156 = arith.constant 0 : index
    %c0_157 = arith.constant 0 : index
    %c0_158 = arith.constant 0 : index
    %203 = vector.load %arg2[%c0_156, %c0_157, %c0_158] : memref<9x8x256xf32, #tpu.memory_space<vmem>>, vector<1x8x256xf32>
    %204 = vector.shape_cast %203 : vector<1x8x256xf32> to vector<8x256xf32>
    %205 = arith.mulf %202, %204 : vector<8x256xf32>
    %206 = arith.truncf %205 : vector<8x256xf32> to vector<8x256xbf16>
    %c0_159 = arith.constant 0 : index
    %c0_160 = arith.constant 0 : index
    %207 = vector.load %arg12[%c0_159, %c0_160] : memref<80x512xbf16, #tpu.memory_space<vmem>>, vector<8x256xbf16>
    tpu.vector_store %arg12[%c0_159, %c0_160], %206 {strides = array<i32>} : memref<80x512xbf16, #tpu.memory_space<vmem>>, vector<8x256xbf16>,
    %c0_161 = arith.constant 0 : index
    %c112_162 = arith.constant 112 : index
    %208 = vector.load %arg11[%c0_161, %c112_162] : memref<8x512xf32, #tpu.memory_space<vmem>>, vector<8x256xf32>
    %c1_163 = arith.constant 1 : index
    %c0_164 = arith.constant 0 : index
    %c0_165 = arith.constant 0 : index
    %209 = vector.load %arg2[%c1_163, %c0_164, %c0_165] : memref<9x8x256xf32, #tpu.memory_space<vmem>>, vector<1x8x256xf32>
    %210 = vector.shape_cast %209 : vector<1x8x256xf32> to vector<8x256xf32>
    %211 = arith.mulf %208, %210 : vector<8x256xf32>
    %212 = arith.truncf %211 : vector<8x256xf32> to vector<8x256xbf16>
    %c8_166 = arith.constant 8 : index
    %c0_167 = arith.constant 0 : index
    %213 = vector.load %arg12[%c8_166, %c0_167] : memref<80x512xbf16, #tpu.memory_space<vmem>>, vector<8x256xbf16>
    tpu.vector_store %arg12[%c8_166, %c0_167], %212 {strides = array<i32>} : memref<80x512xbf16, #tpu.memory_space<vmem>>, vector<8x256xbf16>,
    %c0_168 = arith.constant 0 : index
    %c113_169 = arith.constant 113 : index
    %214 = vector.load %arg11[%c0_168, %c113_169] : memref<8x512xf32, #tpu.memory_space<vmem>>, vector<8x256xf32>
    %c2_170 = arith.constant 2 : index
    %c0_171 = arith.constant 0 : index
    %c0_172 = arith.constant 0 : index
    %215 = vector.load %arg2[%c2_170, %c0_171, %c0_172] : memref<9x8x256xf32, #tpu.memory_space<vmem>>, vector<1x8x256xf32>
    %216 = vector.shape_cast %215 : vector<1x8x256xf32> to vector<8x256xf32>
    %217 = arith.mulf %214, %216 : vector<8x256xf32>
    %218 = arith.truncf %217 : vector<8x256xf32> to vector<8x256xbf16>
    %c16_173 = arith.constant 16 : index
    %c0_174 = arith.constant 0 : index
    %219 = vector.load %arg12[%c16_173, %c0_174] : memref<80x512xbf16, #tpu.memory_space<vmem>>, vector<8x256xbf16>
    tpu.vector_store %arg12[%c16_173, %c0_174], %218 {strides = array<i32>} : memref<80x512xbf16, #tpu.memory_space<vmem>>, vector<8x256xbf16>,
    %c0_175 = arith.constant 0 : index
    %c127_176 = arith.constant 127 : index
    %220 = vector.load %arg11[%c0_175, %c127_176] : memref<8x512xf32, #tpu.memory_space<vmem>>, vector<8x256xf32>
    %c3_177 = arith.constant 3 : index
    %c0_178 = arith.constant 0 : index
    %c0_179 = arith.constant 0 : index
    %221 = vector.load %arg2[%c3_177, %c0_178, %c0_179] : memref<9x8x256xf32, #tpu.memory_space<vmem>>, vector<1x8x256xf32>
    %222 = vector.shape_cast %221 : vector<1x8x256xf32> to vector<8x256xf32>
    %223 = arith.mulf %220, %222 : vector<8x256xf32>
    %224 = arith.truncf %223 : vector<8x256xf32> to vector<8x256xbf16>
    %c24_180 = arith.constant 24 : index
    %c0_181 = arith.constant 0 : index
    %225 = vector.load %arg12[%c24_180, %c0_181] : memref<80x512xbf16, #tpu.memory_space<vmem>>, vector<8x256xbf16>
    tpu.vector_store %arg12[%c24_180, %c0_181], %224 {strides = array<i32>} : memref<80x512xbf16, #tpu.memory_space<vmem>>, vector<8x256xbf16>,
    %c0_182 = arith.constant 0 : index
    %c128_183 = arith.constant 128 : index
    %226 = vector.load %arg11[%c0_182, %c128_183] : memref<8x512xf32, #tpu.memory_space<vmem>>, vector<8x256xf32>
    %227 = arith.truncf %226 : vector<8x256xf32> to vector<8x256xbf16>
    %c32_184 = arith.constant 32 : index
    %c0_185 = arith.constant 0 : index
    %228 = vector.load %arg12[%c32_184, %c0_185] : memref<80x512xbf16, #tpu.memory_space<vmem>>, vector<8x256xbf16>
    tpu.vector_store %arg12[%c32_184, %c0_185], %227 {strides = array<i32>} : memref<80x512xbf16, #tpu.memory_space<vmem>>, vector<8x256xbf16>,
    %c0_186 = arith.constant 0 : index
    %c129_187 = arith.constant 129 : index
    %229 = vector.load %arg11[%c0_186, %c129_187] : memref<8x512xf32, #tpu.memory_space<vmem>>, vector<8x256xf32>
    %c5_188 = arith.constant 5 : index
    %c0_189 = arith.constant 0 : index
    %c0_190 = arith.constant 0 : index
    %230 = vector.load %arg2[%c5_188, %c0_189, %c0_190] : memref<9x8x256xf32, #tpu.memory_space<vmem>>, vector<1x8x256xf32>
    %231 = vector.shape_cast %230 : vector<1x8x256xf32> to vector<8x256xf32>
    %232 = arith.mulf %229, %231 : vector<8x256xf32>
    %233 = arith.truncf %232 : vector<8x256xf32> to vector<8x256xbf16>
    %c40_191 = arith.constant 40 : index
    %c0_192 = arith.constant 0 : index
    %234 = vector.load %arg12[%c40_191, %c0_192] : memref<80x512xbf16, #tpu.memory_space<vmem>>, vector<8x256xbf16>
    tpu.vector_store %arg12[%c40_191, %c0_192], %233 {strides = array<i32>} : memref<80x512xbf16, #tpu.memory_space<vmem>>, vector<8x256xbf16>,
    %c0_193 = arith.constant 0 : index
    %c143_194 = arith.constant 143 : index
    %235 = vector.load %arg11[%c0_193, %c143_194] : memref<8x512xf32, #tpu.memory_space<vmem>>, vector<8x256xf32>
    %c6_195 = arith.constant 6 : index
    %c0_196 = arith.constant 0 : index
    %c0_197 = arith.constant 0 : index
    %236 = vector.load %arg2[%c6_195, %c0_196, %c0_197] : memref<9x8x256xf32, #tpu.memory_space<vmem>>, vector<1x8x256xf32>
    %237 = vector.shape_cast %236 : vector<1x8x256xf32> to vector<8x256xf32>
    %238 = arith.mulf %235, %237 : vector<8x256xf32>
    %239 = arith.truncf %238 : vector<8x256xf32> to vector<8x256xbf16>
    %c48_198 = arith.constant 48 : index
    %c0_199 = arith.constant 0 : index
    %240 = vector.load %arg12[%c48_198, %c0_199] : memref<80x512xbf16, #tpu.memory_space<vmem>>, vector<8x256xbf16>
    tpu.vector_store %arg12[%c48_198, %c0_199], %239 {strides = array<i32>} : memref<80x512xbf16, #tpu.memory_space<vmem>>, vector<8x256xbf16>,
    %c0_200 = arith.constant 0 : index
    %c144_201 = arith.constant 144 : index
    %241 = vector.load %arg11[%c0_200, %c144_201] : memref<8x512xf32, #tpu.memory_space<vmem>>, vector<8x256xf32>
    %c7_202 = arith.constant 7 : index
    %c0_203 = arith.constant 0 : index
    %c0_204 = arith.constant 0 : index
    %242 = vector.load %arg2[%c7_202, %c0_203, %c0_204] : memref<9x8x256xf32, #tpu.memory_space<vmem>>, vector<1x8x256xf32>
    %243 = vector.shape_cast %242 : vector<1x8x256xf32> to vector<8x256xf32>
    %244 = arith.mulf %241, %243 : vector<8x256xf32>
    %245 = arith.truncf %244 : vector<8x256xf32> to vector<8x256xbf16>
    %c56_205 = arith.constant 56 : index
    %c0_206 = arith.constant 0 : index
    %246 = vector.load %arg12[%c56_205, %c0_206] : memref<80x512xbf16, #tpu.memory_space<vmem>>, vector<8x256xbf16>
    tpu.vector_store %arg12[%c56_205, %c0_206], %245 {strides = array<i32>} : memref<80x512xbf16, #tpu.memory_space<vmem>>, vector<8x256xbf16>,
    %c0_207 = arith.constant 0 : index
    %c145_208 = arith.constant 145 : index
    %247 = vector.load %arg11[%c0_207, %c145_208] : memref<8x512xf32, #tpu.memory_space<vmem>>, vector<8x256xf32>
    %c8_209 = arith.constant 8 : index
    %c0_210 = arith.constant 0 : index
    %c0_211 = arith.constant 0 : index
    %248 = vector.load %arg2[%c8_209, %c0_210, %c0_211] : memref<9x8x256xf32, #tpu.memory_space<vmem>>, vector<1x8x256xf32>
    %249 = vector.shape_cast %248 : vector<1x8x256xf32> to vector<8x256xf32>
    %250 = arith.mulf %247, %249 : vector<8x256xf32>
    %251 = arith.truncf %250 : vector<8x256xf32> to vector<8x256xbf16>
    %c64_212 = arith.constant 64 : index
    %c0_213 = arith.constant 0 : index
    %252 = vector.load %arg12[%c64_212, %c0_213] : memref<80x512xbf16, #tpu.memory_space<vmem>>, vector<8x256xbf16>
    tpu.vector_store %arg12[%c64_212, %c0_213], %251 {strides = array<i32>} : memref<80x512xbf16, #tpu.memory_space<vmem>>, vector<8x256xbf16>,
    %253 = vector.extract_strided_slice %174 {offsets = [0, 256], sizes = [4, 256], strides = [1, 1]} : vector<4x512xf32> to vector<4x256xf32>
    %cst_214 = arith.constant dense<0.000000e+00> : vector<4xf32>
    %254 = vector.multi_reduction <add>, %253, %cst_214 [1] : vector<4x256xf32> to vector<4xf32>
    %255 = vector.shape_cast %254 : vector<4xf32> to vector<4x1xf32>
    %cst_215 = arith.constant 3.906250e-03 : f32
    %256 = vector.broadcast %cst_215 : f32 to vector<4x1xf32>
    %257 = arith.mulf %255, %256 : vector<4x1xf32>
    %258 = vector.broadcast %257 : vector<4x1xf32> to vector<4x256xf32>
    %259 = arith.subf %253, %258 : vector<4x256xf32>
    %260 = arith.mulf %259, %259 : vector<4x256xf32>
    %cst_216 = arith.constant dense<0.000000e+00> : vector<4xf32>
    %261 = vector.multi_reduction <add>, %260, %cst_216 [1] : vector<4x256xf32> to vector<4xf32>
    %262 = vector.shape_cast %261 : vector<4xf32> to vector<4x1xf32>
    %cst_217 = arith.constant 3.906250e-03 : f32
    %263 = vector.broadcast %cst_217 : f32 to vector<4x1xf32>
    %264 = arith.mulf %262, %263 : vector<4x1xf32>
    %cst_218 = arith.constant 9.99999974E-6 : f32
    %265 = vector.broadcast %cst_218 : f32 to vector<4x1xf32>
    %266 = arith.addf %264, %265 : vector<4x1xf32>
    %267 = math.rsqrt %266 : vector<4x1xf32>
    %268 = vector.broadcast %267 : vector<4x1xf32> to vector<4x256xf32>
    %269 = arith.mulf %259, %268 : vector<4x256xf32>
    %270 = vector.broadcast %4 : vector<4x1xf32> to vector<4x256xf32>
    %271 = arith.mulf %269, %270 : vector<4x256xf32>
    %272 = vector.broadcast %5 : vector<4x1xf32> to vector<4x256xf32>
    %273 = arith.addf %271, %272 : vector<4x256xf32>
    %cst_219 = arith.constant 0.000000e+00 : f32
    %274 = vector.broadcast %cst_219 : f32 to vector<4x256xf32>
    %275 = arith.cmpf ogt, %273, %274 : vector<4x256xf32>
    %cst_220 = arith.constant 0.00999999977 : f32
    %276 = vector.broadcast %cst_220 : f32 to vector<4x256xf32>
    %277 = arith.mulf %276, %273 : vector<4x256xf32>
    %278 = arith.select %275, %273, %277 : vector<4x256xi1>, vector<4x256xf32>
    %c0_221 = arith.constant 0 : index
    %c128_222 = arith.constant 128 : index
    %279 = vector.load %arg11[%c0_221, %c128_222] : memref<8x512xf32, #tpu.memory_space<vmem>>, vector<4x256xf32>
    tpu.vector_store %arg11[%c0_221, %c128_222], %278 {strides = array<i32>} : memref<8x512xf32, #tpu.memory_space<vmem>>, vector<4x256xf32>,
    %c0_223 = arith.constant 0 : index
    %c111_224 = arith.constant 111 : index
    %280 = vector.load %arg11[%c0_223, %c111_224] : memref<8x512xf32, #tpu.memory_space<vmem>>, vector<8x256xf32>
    %c0_225 = arith.constant 0 : index
    %c0_226 = arith.constant 0 : index
    %c0_227 = arith.constant 0 : index
    %281 = vector.load %arg2[%c0_225, %c0_226, %c0_227] : memref<9x8x256xf32, #tpu.memory_space<vmem>>, vector<1x8x256xf32>
    %282 = vector.shape_cast %281 : vector<1x8x256xf32> to vector<8x256xf32>
    %283 = arith.mulf %280, %282 : vector<8x256xf32>
    %284 = arith.truncf %283 : vector<8x256xf32> to vector<8x256xbf16>
    %c0_228 = arith.constant 0 : index
    %c256_229 = arith.constant 256 : index
    %285 = vector.load %arg12[%c0_228, %c256_229] : memref<80x512xbf16, #tpu.memory_space<vmem>>, vector<8x256xbf16>
    tpu.vector_store %arg12[%c0_228, %c256_229], %284 {strides = array<i32>} : memref<80x512xbf16, #tpu.memory_space<vmem>>, vector<8x256xbf16>,
    %c0_230 = arith.constant 0 : index
    %c112_231 = arith.constant 112 : index
    %286 = vector.load %arg11[%c0_230, %c112_231] : memref<8x512xf32, #tpu.memory_space<vmem>>, vector<8x256xf32>
    %c1_232 = arith.constant 1 : index
    %c0_233 = arith.constant 0 : index
    %c0_234 = arith.constant 0 : index
    %287 = vector.load %arg2[%c1_232, %c0_233, %c0_234] : memref<9x8x256xf32, #tpu.memory_space<vmem>>, vector<1x8x256xf32>
    %288 = vector.shape_cast %287 : vector<1x8x256xf32> to vector<8x256xf32>
    %289 = arith.mulf %286, %288 : vector<8x256xf32>
    %290 = arith.truncf %289 : vector<8x256xf32> to vector<8x256xbf16>
    %c8_235 = arith.constant 8 : index
    %c256_236 = arith.constant 256 : index
    %291 = vector.load %arg12[%c8_235, %c256_236] : memref<80x512xbf16, #tpu.memory_space<vmem>>, vector<8x256xbf16>
    tpu.vector_store %arg12[%c8_235, %c256_236], %290 {strides = array<i32>} : memref<80x512xbf16, #tpu.memory_space<vmem>>, vector<8x256xbf16>,
    %c0_237 = arith.constant 0 : index
    %c113_238 = arith.constant 113 : index
    %292 = vector.load %arg11[%c0_237, %c113_238] : memref<8x512xf32, #tpu.memory_space<vmem>>, vector<8x256xf32>
    %c2_239 = arith.constant 2 : index
    %c0_240 = arith.constant 0 : index
    %c0_241 = arith.constant 0 : index
    %293 = vector.load %arg2[%c2_239, %c0_240, %c0_241] : memref<9x8x256xf32, #tpu.memory_space<vmem>>, vector<1x8x256xf32>
    %294 = vector.shape_cast %293 : vector<1x8x256xf32> to vector<8x256xf32>
    %295 = arith.mulf %292, %294 : vector<8x256xf32>
    %296 = arith.truncf %295 : vector<8x256xf32> to vector<8x256xbf16>
    %c16_242 = arith.constant 16 : index
    %c256_243 = arith.constant 256 : index
    %297 = vector.load %arg12[%c16_242, %c256_243] : memref<80x512xbf16, #tpu.memory_space<vmem>>, vector<8x256xbf16>
    tpu.vector_store %arg12[%c16_242, %c256_243], %296 {strides = array<i32>} : memref<80x512xbf16, #tpu.memory_space<vmem>>, vector<8x256xbf16>,
    %c0_244 = arith.constant 0 : index
    %c127_245 = arith.constant 127 : index
    %298 = vector.load %arg11[%c0_244, %c127_245] : memref<8x512xf32, #tpu.memory_space<vmem>>, vector<8x256xf32>
    %c3_246 = arith.constant 3 : index
    %c0_247 = arith.constant 0 : index
    %c0_248 = arith.constant 0 : index
    %299 = vector.load %arg2[%c3_246, %c0_247, %c0_248] : memref<9x8x256xf32, #tpu.memory_space<vmem>>, vector<1x8x256xf32>
    %300 = vector.shape_cast %299 : vector<1x8x256xf32> to vector<8x256xf32>
    %301 = arith.mulf %298, %300 : vector<8x256xf32>
    %302 = arith.truncf %301 : vector<8x256xf32> to vector<8x256xbf16>
    %c24_249 = arith.constant 24 : index
    %c256_250 = arith.constant 256 : index
    %303 = vector.load %arg12[%c24_249, %c256_250] : memref<80x512xbf16, #tpu.memory_space<vmem>>, vector<8x256xbf16>
    tpu.vector_store %arg12[%c24_249, %c256_250], %302 {strides = array<i32>} : memref<80x512xbf16, #tpu.memory_space<vmem>>, vector<8x256xbf16>,
    %c0_251 = arith.constant 0 : index
    %c128_252 = arith.constant 128 : index
    %304 = vector.load %arg11[%c0_251, %c128_252] : memref<8x512xf32, #tpu.memory_space<vmem>>, vector<8x256xf32>
    %305 = arith.truncf %304 : vector<8x256xf32> to vector<8x256xbf16>
    %c32_253 = arith.constant 32 : index
    %c256_254 = arith.constant 256 : index
    %306 = vector.load %arg12[%c32_253, %c256_254] : memref<80x512xbf16, #tpu.memory_space<vmem>>, vector<8x256xbf16>
    tpu.vector_store %arg12[%c32_253, %c256_254], %305 {strides = array<i32>} : memref<80x512xbf16, #tpu.memory_space<vmem>>, vector<8x256xbf16>,
    %c0_255 = arith.constant 0 : index
    %c129_256 = arith.constant 129 : index
    %307 = vector.load %arg11[%c0_255, %c129_256] : memref<8x512xf32, #tpu.memory_space<vmem>>, vector<8x256xf32>
    %c5_257 = arith.constant 5 : index
    %c0_258 = arith.constant 0 : index
    %c0_259 = arith.constant 0 : index
    %308 = vector.load %arg2[%c5_257, %c0_258, %c0_259] : memref<9x8x256xf32, #tpu.memory_space<vmem>>, vector<1x8x256xf32>
    %309 = vector.shape_cast %308 : vector<1x8x256xf32> to vector<8x256xf32>
    %310 = arith.mulf %307, %309 : vector<8x256xf32>
    %311 = arith.truncf %310 : vector<8x256xf32> to vector<8x256xbf16>
    %c40_260 = arith.constant 40 : index
    %c256_261 = arith.constant 256 : index
    %312 = vector.load %arg12[%c40_260, %c256_261] : memref<80x512xbf16, #tpu.memory_space<vmem>>, vector<8x256xbf16>
    tpu.vector_store %arg12[%c40_260, %c256_261], %311 {strides = array<i32>} : memref<80x512xbf16, #tpu.memory_space<vmem>>, vector<8x256xbf16>,
    %c0_262 = arith.constant 0 : index
    %c143_263 = arith.constant 143 : index
    %313 = vector.load %arg11[%c0_262, %c143_263] : memref<8x512xf32, #tpu.memory_space<vmem>>, vector<8x256xf32>
    %c6_264 = arith.constant 6 : index
    %c0_265 = arith.constant 0 : index
    %c0_266 = arith.constant 0 : index
    %314 = vector.load %arg2[%c6_264, %c0_265, %c0_266] : memref<9x8x256xf32, #tpu.memory_space<vmem>>, vector<1x8x256xf32>
    %315 = vector.shape_cast %314 : vector<1x8x256xf32> to vector<8x256xf32>
    %316 = arith.mulf %313, %315 : vector<8x256xf32>
    %317 = arith.truncf %316 : vector<8x256xf32> to vector<8x256xbf16>
    %c48_267 = arith.constant 48 : index
    %c256_268 = arith.constant 256 : index
    %318 = vector.load %arg12[%c48_267, %c256_268] : memref<80x512xbf16, #tpu.memory_space<vmem>>, vector<8x256xbf16>
    tpu.vector_store %arg12[%c48_267, %c256_268], %317 {strides = array<i32>} : memref<80x512xbf16, #tpu.memory_space<vmem>>, vector<8x256xbf16>,
    %c0_269 = arith.constant 0 : index
    %c144_270 = arith.constant 144 : index
    %319 = vector.load %arg11[%c0_269, %c144_270] : memref<8x512xf32, #tpu.memory_space<vmem>>, vector<8x256xf32>
    %c7_271 = arith.constant 7 : index
    %c0_272 = arith.constant 0 : index
    %c0_273 = arith.constant 0 : index
    %320 = vector.load %arg2[%c7_271, %c0_272, %c0_273] : memref<9x8x256xf32, #tpu.memory_space<vmem>>, vector<1x8x256xf32>
    %321 = vector.shape_cast %320 : vector<1x8x256xf32> to vector<8x256xf32>
    %322 = arith.mulf %319, %321 : vector<8x256xf32>
    %323 = arith.truncf %322 : vector<8x256xf32> to vector<8x256xbf16>
    %c56_274 = arith.constant 56 : index
    %c256_275 = arith.constant 256 : index
    %324 = vector.load %arg12[%c56_274, %c256_275] : memref<80x512xbf16, #tpu.memory_space<vmem>>, vector<8x256xbf16>
    tpu.vector_store %arg12[%c56_274, %c256_275], %323 {strides = array<i32>} : memref<80x512xbf16, #tpu.memory_space<vmem>>, vector<8x256xbf16>,
    %c0_276 = arith.constant 0 : index
    %c145_277 = arith.constant 145 : index
    %325 = vector.load %arg11[%c0_276, %c145_277] : memref<8x512xf32, #tpu.memory_space<vmem>>, vector<8x256xf32>
    %c8_278 = arith.constant 8 : index
    %c0_279 = arith.constant 0 : index
    %c0_280 = arith.constant 0 : index
    %326 = vector.load %arg2[%c8_278, %c0_279, %c0_280] : memref<9x8x256xf32, #tpu.memory_space<vmem>>, vector<1x8x256xf32>
    %327 = vector.shape_cast %326 : vector<1x8x256xf32> to vector<8x256xf32>
    %328 = arith.mulf %325, %327 : vector<8x256xf32>
    %329 = arith.truncf %328 : vector<8x256xf32> to vector<8x256xbf16>
    %c64_281 = arith.constant 64 : index
    %c256_282 = arith.constant 256 : index
    %330 = vector.load %arg12[%c64_281, %c256_282] : memref<80x512xbf16, #tpu.memory_space<vmem>>, vector<8x256xbf16>
    tpu.vector_store %arg12[%c64_281, %c256_282], %329 {strides = array<i32>} : memref<80x512xbf16, #tpu.memory_space<vmem>>, vector<8x256xbf16>,
    %c0_283 = arith.constant 0 : index
    %c0_284 = arith.constant 0 : index
    %331 = vector.load %arg4[%c0_283, %c0_284] : memref<8x80xbf16, #tpu.memory_space<vmem>>, vector<8x80xbf16>
    %c0_285 = arith.constant 0 : index
    %c0_286 = arith.constant 0 : index
    %332 = vector.load %arg12[%c0_285, %c0_286] : memref<80x512xbf16, #tpu.memory_space<vmem>>, vector<80x512xbf16>
    %cst_287 = arith.constant dense<0.000000e+00> : vector<8x512xf32>
    %333 = tpu.matmul %331, %332, %cst_287 {dimension_numbers = #tpu.dot_dimension_numbers<[1], [0], [0], [1], [0, 0, 1, 1], [], []>} : vector<8x80xbf16>, vector<80x512xbf16>, vector<8x512xf32> -> vector<8x512xf32>
    %c0_288 = arith.constant 0 : index
    %c0_289 = arith.constant 0 : index
    %334 = vector.load %arg9[%c0_288, %c0_289] : memref<8x1xf32, #tpu.memory_space<vmem>>, vector<8x1xf32>
    %335 = vector.broadcast %334 : vector<8x1xf32> to vector<8x512xf32>
    %336 = arith.addf %333, %335 : vector<8x512xf32>
    %cst_290 = arith.constant 0.707106769 : f32
    %337 = vector.broadcast %cst_290 : f32 to vector<8x512xf32>
    %338 = arith.mulf %336, %337 : vector<8x512xf32>
    %339 = vector.extract_strided_slice %338 {offsets = [0, 0], sizes = [8, 256], strides = [1, 1]} : vector<8x512xf32> to vector<8x256xf32>
    %c0_291 = arith.constant 0 : index
    %c0_292 = arith.constant 0 : index
    %c0_293 = arith.constant 0 : index
    %340 = vector.load %arg10[%c0_291, %c0_292, %c0_293] : memref<2x8x256xf32, #tpu.memory_space<vmem>>, vector<1x8x256xf32>
    %341 = vector.shape_cast %340 : vector<1x8x256xf32> to vector<8x256xf32>
    %342 = vector.shape_cast %339 : vector<8x256xf32> to vector<1x8x256xf32>
    tpu.vector_store %arg10[%c0_291, %c0_292, %c0_293], %342 {strides = array<i32>} : memref<2x8x256xf32, #tpu.memory_space<vmem>>, vector<1x8x256xf32>,
    %343 = vector.extract_strided_slice %338 {offsets = [0, 256], sizes = [8, 256], strides = [1, 1]} : vector<8x512xf32> to vector<8x256xf32>
    %c1_294 = arith.constant 1 : index
    %c0_295 = arith.constant 0 : index
    %c0_296 = arith.constant 0 : index
    %344 = vector.load %arg10[%c1_294, %c0_295, %c0_296] : memref<2x8x256xf32, #tpu.memory_space<vmem>>, vector<1x8x256xf32>
    %345 = vector.shape_cast %344 : vector<1x8x256xf32> to vector<8x256xf32>
    %346 = vector.shape_cast %343 : vector<8x256xf32> to vector<1x8x256xf32>
    tpu.vector_store %arg10[%c1_294, %c0_295, %c0_296], %346 {strides = array<i32>} : memref<2x8x256xf32, #tpu.memory_space<vmem>>, vector<1x8x256xf32>,
    return
  }
  func.func @transform_0(%arg0: i32) -> (i32, i32, i32) {
    %c0_i32 = arith.constant 0 : i32
    %c0_i32_0 = arith.constant 0 : i32
    %c0_i32_1 = arith.constant 0 : i32
    return %arg0, %c0_i32, %c0_i32_0 : i32, i32, i32
  }
  func.func @transform_1(%arg0: i32) -> (i32, i32, i32) {
    %c0_i32 = arith.constant 0 : i32
    %c0_i32_0 = arith.constant 0 : i32
    %c0_i32_1 = arith.constant 0 : i32
    %c0_i32_2 = arith.constant 0 : i32
    return %c0_i32, %c0_i32_0, %c0_i32_1 : i32, i32, i32
  }
  func.func @transform_2(%arg0: i32) -> (i32, i32) {
    %c0_i32 = arith.constant 0 : i32
    %c0_i32_0 = arith.constant 0 : i32
    %c0_i32_1 = arith.constant 0 : i32
    return %c0_i32, %c0_i32_0 : i32, i32
  }
  func.func @transform_3(%arg0: i32) -> (i32, i32) {
    %c0_i32 = arith.constant 0 : i32
    %c0_i32_0 = arith.constant 0 : i32
    %c0_i32_1 = arith.constant 0 : i32
    return %c0_i32, %c0_i32_0 : i32, i32
  }
  func.func @transform_4(%arg0: i32) -> (i32, i32) {
    %c0_i32 = arith.constant 0 : i32
    %c0_i32_0 = arith.constant 0 : i32
    %c0_i32_1 = arith.constant 0 : i32
    return %c0_i32, %c0_i32_0 : i32, i32
  }
  func.func @transform_5(%arg0: i32) -> (i32, i32) {
    %c0_i32 = arith.constant 0 : i32
    %c0_i32_0 = arith.constant 0 : i32
    %c0_i32_1 = arith.constant 0 : i32
    return %c0_i32, %c0_i32_0 : i32, i32
  }
  func.func @transform_6(%arg0: i32) -> (i32, i32) {
    %c0_i32 = arith.constant 0 : i32
    %c0_i32_0 = arith.constant 0 : i32
    %c0_i32_1 = arith.constant 0 : i32
    return %c0_i32, %c0_i32_0 : i32, i32
  }
  func.func @transform_7(%arg0: i32) -> (i32, i32) {
    %c0_i32 = arith.constant 0 : i32
    %c0_i32_0 = arith.constant 0 : i32
    %c0_i32_1 = arith.constant 0 : i32
    return %c0_i32, %c0_i32_0 : i32, i32
  }
  func.func @transform_8(%arg0: i32) -> (i32, i32) {
    %c0_i32 = arith.constant 0 : i32
    %c0_i32_0 = arith.constant 0 : i32
    %c0_i32_1 = arith.constant 0 : i32
    return %c0_i32, %c0_i32_0 : i32, i32
  }
  func.func @transform_9(%arg0: i32) -> (i32, i32, i32) {
    %c0_i32 = arith.constant 0 : i32
    %c0_i32_0 = arith.constant 0 : i32
    %c0_i32_1 = arith.constant 0 : i32
    return %arg0, %c0_i32, %c0_i32_0 : i32, i32, i32
  }
}

</mosaic_0001>

<bundles_post_ra>
// kernel: resblk5_3_forward.1
= control target key start
LH: loop header
LB: loop body
LE: loop exit
PB: predicated region body
PF: predicated region fallthrough
CT: control target
= control target key end

     0   :  { %vm59_vm0 = vcmask 1043456   ;;  %v1839_v0 = vmov 0.0   ;;  %v1840_v2 = vmov 0   ;;  %s1841_s15 = smov 112   ;;  %s1842_s20 = smov 111   ;;  %v70_v38 = vlaneseq  ;;  %s2834_s0 = inlined_call_operand.vmem [shape: f32[2,4,256], index: 0, kind: input, shape index: {}]   ;;  %s2835_s5 = inlined_call_operand.vmem [shape: f32[4,1], index: 5, kind: input, shape index: {}]   ;;  %s2836_s1 = inlined_call_operand.vmem [shape: f32[9,8,256], index: 1, kind: input, shape index: {}]   ;;  %s2837_s4 = inlined_call_operand.vmem [shape: f32[4,1], index: 4, kind: input, shape index: {}]   ;;  %s2838_s7 = inlined_call_operand.vmem [shape: f32[4,1], index: 7, kind: input, shape index: {}]   ;;  %s2839_s6 = inlined_call_operand.vmem [shape: f32[4,1], index: 6, kind: input, shape index: {}]   ;;  %s2840_s2 = inlined_call_operand.vmem [shape: bf16[4,80], index: 2, kind: input, shape index: {}]   ;;  %s2841_s8 = inlined_call_operand.vmem [shape: f32[8,1], index: 8, kind: input, shape index: {}]   ;;  %s2842_s3 = inlined_call_operand.vmem [shape: bf16[8,80], index: 3, kind: input, shape index: {}]   ;;  %s2843_s9 = inlined_call_operand.vmem [shape: f32[2,8,256], index: 9, kind: output, shape index: {}]  }
   0x1   :  { %34 = vst [vmem:[#allocation2 + $0x8] sm:$0xff] %v1839_v0  ;;  %35 = vst [vmem:[#allocation2 + $0x10] sm:$0xff] %v1839_v0  ;;  %v1903_v1 = vld [vmem:[%s2834_s0] sm:$0xff]  ;;  %1827 = vset.pattern.permute.xlu1 %v1840_v2  ;;  %v1912_v4 = vld [vmem:[%s2834_s0 + $0x8] sm:$0xff]  ;;  %1826 = vset.pattern.permute.xlu0 %v1840_v2  ;;  %s1843_s25 = smov 127   ;;  %s1844_s11 = smov 113  }
   0x2   :  { %33 = vst [vmem:[#allocation2] sm:$0xff] %v1839_v0  ;;  %v38_v3 = vld [vmem:[%s2835_s5] sm:$0xf]  ;;  %v43_v5 = vcombine.high %v1903_v1, %v1903_v1  ;;  %45 = vst [vmem:[#allocation2 + $0x8] sm:$0xf] %v1903_v1  ;;  %v60_v6 = vsel %vm59_vm0, %v1903_v1, 0.0  ;;  %v1922_v7 = vcombine.high %v1912_v4, %v1912_v4  ;;  %891 = vmatprep.mubr.bf16.mxu0 %v1840_v2  ;;  %932 = vmatprep.mubr.bf16.mxu1 %v1840_v2 }
   0x3   :  { %113 = vperm.xlu1 %1827, %v38_v3   ;;  %v1752_v8 = vld [vmem:[%s2836_s1 + $0x10] sm:$0xff]  ;;  %v480_v10 = vsel %vm59_vm0, %v1912_v4, 0.0  ;;  %v1753_v14 = vld [vmem:[%s2836_s1 + $0x18] sm:$0xff]  ;;  %v135_v15 = vld [vmem:[%s2836_s1] sm:$0xff]  ;;  %s1845_s0 = smov 1   ;;  %s1846_s19 = smov 16  }
   0x4   :  { %v61_v9 = vsel %vm59_vm0, %v43_v5, 0.0  ;;  %46 = vst [vmem:[#allocation2 + $0x10] sm:$0xf] %v43_v5  ;;  %v481_v11 = vsel %vm59_vm0, %v1922_v7, 0.0  ;;  %v136_v16 = vld [vmem:[%s2836_s1 + $0x8] sm:$0xff]  ;;  %v1756_v17 = vld [vmem:[%s2836_s1 + $0x30] sm:$0xff] }
   0x5   :  { %v62_v12 = vadd.f32 %v61_v9, %v60_v6  ;;  %v482_v13 = vadd.f32 %v481_v11, %v480_v10  ;;  %v1757_v18 = vld [vmem:[%s2836_s1 + $0x38] sm:$0xff]  ;;  %v1754_v19 = vld [vmem:[%s2836_s1 + $0x20] sm:$0xff]  ;;  %v1758_v21 = vld [vmem:[%s2836_s1 + $0x50] sm:$0xff]  ;;  %s1847_s26 = smov 15   ;;  %s1848_s10 = smov 17   ;;  %v71_v41 = vshrl.u32 %v70_v38, 7 }
   0x6   :  { %v37_v20 = vld [vmem:[%s2837_s4] sm:$0xf]  ;;  %v1755_v22 = vld [vmem:[%s2836_s1 + $0x28] sm:$0xff]  ;;  %v1759_v23 = vld [vmem:[%s2836_s1 + $0x58] sm:$0xff]  ;;  %v1849_v36 = vmov 839922192  }
   0x7   :  { %178 = vrot.lane.b32.xlu1 %v1752_v8, %s1841_s15  ;;  %63 = vadd.xlane.f32.xlu0 %v62_v12  ;;  %v1762_v24 = vld [vmem:[%s2836_s1 + $0x70] sm:$0xff]  ;;  %v1763_v25 = vld [vmem:[%s2836_s1 + $0x78] sm:$0xff]  ;;  %v1989_v26 = vld [vmem:[%s2836_s1 + $0x60] sm:$0xff]  ;;  %v68_v37 = vunpack.c.l.s4 %v1849_v36  ;;  %vm143_vm2 = vcmask 908288   ;;  %vm182_vm3 = vcmask 916480   ;;  %vm224_vm4 = vcmask 924672  }
   0x8   :  { %v1761_v27 = vld [vmem:[%s2836_s1 + $0x68] sm:$0xff]  ;;  %v2004_v28 = vld [vmem:[%s2836_s1 + $0x80] sm:$0xff]  ;;  %vm263_vm5 = vcmask 1039360   ;;  %vm244_vm6 = vcmask 121856   ;;  %vm286_vm7 = vcmask 7168   ;;  %vm163_vm8 = vcmask 138240  }
   0x9   :  { %v1765_v29 = vld [vmem:[%s2836_s1 + $0x88] sm:$0xff]  ;;  %v69_v40 = vunpack.c.0.s8 %v68_v37  ;;  %vm205_vm9 = vcmask 130048   ;;  %vm855_vm11 = vcmask 654336  }
   0xb   :  { %180 = vrot.lane.b32.xlu1 %v1753_v14, %s1841_s15  ;;  %483 = vadd.xlane.f32.xlu0 %v482_v13  ;;  %v2030_v43 = vsub.s32 %v69_v40, %v71_v41 }
   0xf   :  { %139 = vrot.lane.b32.xlu1 %v135_v15, %s1842_s20 }
  0x13   :  { %141 = vrot.lane.b32.xlu1 %v136_v16, %s1842_s20 }
  0x17   :  { %259 = vrot.lane.b32.xlu1 %v1756_v17, %s1843_s25 }
  0x1b   :  { %261 = vrot.lane.b32.xlu1 %v1757_v18, %s1843_s25 }
  0x1f   :  { %220 = vrot.lane.b32.xlu1 %v1754_v19, %s1844_s11 }
  0x21   :  { %100 = vperm.xlu0 %1826, %v37_v20  }
  0x23   :  { %307 = vrot.lane.b32.xlu1 %v1758_v21, %s1845_s0 }
  0x25   :  { %222 = vrot.lane.b32.xlu0 %v1755_v22, %s1844_s11 }
  0x27   :  { %571 = vrot.lane.b32.xlu1 %v1752_v8, %s1841_s15 }
  0x29   :  { %309 = vrot.lane.b32.xlu0 %v1759_v23, %s1845_s0 }
  0x2b   :  { %535 = vrot.lane.b32.xlu1 %v135_v15, %s1842_s20 }
  0x2d   :  { %573 = vrot.lane.b32.xlu0 %v1753_v14, %s1841_s15 }
  0x2f   :  { %388 = vrot.lane.b32.xlu1 %v1762_v24, %s1846_s19 }
  0x31   :  { %537 = vrot.lane.b32.xlu0 %v136_v16, %s1842_s20 }
  0x33   :  { %646 = vrot.lane.b32.xlu1 %v1756_v17, %s1843_s25 }
  0x35   :  { %390 = vrot.lane.b32.xlu0 %v1763_v25, %s1846_s19 }
  0x37   :  { %349 = vrot.lane.b32.xlu1 %v1989_v26, %s1847_s26 }
  0x39   :  { %648 = vrot.lane.b32.xlu0 %v1757_v18, %s1843_s25 }
  0x3b   :  { %610 = vrot.lane.b32.xlu1 %v1754_v19, %s1844_s11 }
  0x3d   :  { %351 = vrot.lane.b32.xlu0 %v1761_v27, %s1847_s26 }
  0x3f   :  { %691 = vrot.lane.b32.xlu1 %v1758_v21, %s1845_s0 }
  0x41   :  { %612 = vrot.lane.b32.xlu0 %v1755_v22, %s1844_s11 }
  0x43   :  { %430 = vrot.lane.b32.xlu1 %v2004_v28, %s1848_s10 }
  0x45   :  { %693 = vrot.lane.b32.xlu0 %v1759_v23, %s1845_s0 }
  0x47   :  { %766 = vrot.lane.b32.xlu1 %v1762_v24, %s1846_s19 }
  0x49   :  { %432 = vrot.lane.b32.xlu0 %v1765_v29, %s1848_s10 }
  0x4d   :  { %768 = vrot.lane.b32.xlu0 %v1763_v25, %s1846_s19 }
  0x51   :  { %732 = vrot.lane.b32.xlu0 %v1761_v27, %s1847_s26 }
  0x55   :  { %807 = vrot.lane.b32.xlu0 %v1765_v29, %s1848_s10 }
  0x82   :  { %v2018_v30 = vpop.permute.xlu1 %113 }
  0x86   :  { %v2020_v31 = vpop.permute.xlu1 %178 }
  0x87   :  { %v187_v32 = vmul.f32 0.0, %v2020_v31 }
  0x89   :  { %v190_v33 = vpack.c.bf16 %v187_v32, %v187_v32 }
  0x8a   :  { %v2023_v34 = vpop.permute.xlu1 %180 }
  0x8b   :  { %v196_v35 = vrot.slane %v190_v33, 4 }
  0x8d   :  { %199 = vrot.lane.b32.xlu0 %v196_v35, %s1846_s19 }
  0x8e   :  { %v2026_v39 = vpop.permute.xlu1 %139 }
  0x8f   :  { %v148_v29 = vmul.f32 0.0, %v2026_v39 }
  0x91   :  { %v151_v36 = vpack.c.bf16 %v148_v29, %v148_v29 }
  0x92   :  { %v2028_v42 = vpop.permute.xlu1 %141 }
  0x94   :  { %v64_v44 = vpop.xlane.xlu0 %63 }
  0x95   :  { %v65_v45 = vmul.f32 0.00390625, %v64_v44 }
  0x96   :  { %v2032_v46 = vpop.permute.xlu1 %259 }
  0x97   :  { %v268_v47 = vmul.f32 0.0, %v2032_v46  ;;  %v73_v48 = vrot.slane %v65_v45, %v2030_v43 }
  0x98   :  { %v484_v52 = vpop.xlane.xlu0 %483 }
  0x99   :  { %v271_v49 = vpack.c.bf16 %v268_v47, %v268_v47  ;;  %v2037_v50 = vsub.f32 %v1903_v1, %v73_v48  ;;  %v485_v16 = vmul.f32 0.00390625, %v484_v52 }
  0x9a   :  { %v2039_v51 = vpop.permute.xlu1 %261 }
  0x9b   :  { %v277_v53 = vrot.slane %v271_v49, 4  ;;  %v76_v54 = vmul.f32 %v2037_v50, %v2037_v50  ;;  %v493_v17 = vrot.slane %v485_v16, %v2030_v43 }
  0x9d   :  { %280 = vrot.lane.b32.xlu0 %v277_v53, %s1845_s0  ;;  %v78_v55 = vcombine.high %v76_v54, %v76_v54  ;;  %v80_v57 = vsel %vm59_vm0, %v76_v54, 0.0  ;;  %v2078_v18 = vsub.f32 %v1912_v4, %v493_v17 }
  0x9e   :  { %v2044_v56 = vpop.permute.xlu1 %220 }
  0x9f   :  { %v81_v58 = vsel %vm59_vm0, %v78_v55, 0.0  ;;  %v496_v19 = vmul.f32 %v2078_v18, %v2078_v18  ;;  %v229_v33 = vmul.f32 0.0, %v2044_v56 }
  0xa0   :  { %v82_v59 = vadd.f32 %v81_v58, %v80_v57  ;;  %v2048_v60 = vpop.permute.xlu0 %100 }
  0xa1   :  { %v498_v20 = vcombine.high %v496_v19, %v496_v19  ;;  %v500_v22 = vsel %vm59_vm0, %v496_v19, 0.0  ;;  %v232_v40 = vpack.c.bf16 %v229_v33, %v229_v33  ;;  %v2133_v29 = vrot.slane %v2048_v60, %v2030_v43 }
  0xa2   :  { %v2050_v61 = vpop.permute.xlu1 %307  ;;  %83 = vadd.xlane.f32.xlu1 %v82_v59 }
  0xa3   :  { %v501_v23 = vsel %vm59_vm0, %v498_v20, 0.0 }
  0xa4   :  { %v2052_v62 = vpop.permute.xlu0 %222  ;;  %v502_v25 = vadd.f32 %v501_v23, %v500_v22 }
  0xa6   :  { %v2054_v63 = vpop.permute.xlu1 %571 }
  0xa7   :  { %v579_v35 = vmul.f32 0.0, %v2054_v63 }
  0xa8   :  { %v2056_v0 = vpop.permute.xlu0 %309 }
  0xa9   :  { %v318_v1 = vmul.f32 0.0, %v2056_v0  ;;  %v582_v38 = vpack.c.bf16 %v579_v35, %v579_v35  ;;  %v2138_v35 = vrot.slane %v2018_v30, %v2030_v43  ;;  %v144_v30 = vsel %vm143_vm2, %v2026_v39, %v2028_v42 }
  0xaa   :  { %v2059_v3 = vpop.permute.xlu1 %535 }
  0xab   :  { %v321_v5 = vpack.c.bf16 %v318_v1, %v318_v1  ;;  %v543_v6 = vmul.f32 0.0, %v2059_v3  ;;  %v588_v45 = vrot.slane %v582_v38, 4 }
  0xac   :  { %v2082_v21 = vpop.permute.xlu0 %573 }
  0xad   :  { %v327_v8 = vrot.slane %v321_v5, 4  ;;  %v546_v10 = vpack.c.bf16 %v543_v6, %v543_v6 }
  0xae   :  { %v2062_v9 = vpop.permute.xlu1 %388 }
  0xaf   :  { %332 = vrot.lane.b32.xlu0 %v327_v8, %s1843_s25 }
  0xb0   :  { %v2086_v24 = vpop.permute.xlu0 %537 }
  0xb2   :  { %v2065_v11 = vpop.permute.xlu1 %646 }
  0xb3   :  { %730 = vrot.lane.b32.xlu1 %v1989_v26, %s1847_s26  ;;  %552 = vrot.lane.b32.xlu0 %v546_v10, %s1848_s10  ;;  %v654_v49 = vmul.f32 0.0, %v2065_v11 }
  0xb4   :  { %v2088_v26 = vpop.permute.xlu0 %390 }
  0xb5   :  { %v399_v41 = vmul.f32 0.0, %v2088_v26  ;;  %v657_v54 = vpack.c.bf16 %v654_v49, %v654_v49  ;;  %v183_v49 = vsel %vm182_vm3, %v2020_v31, %v2023_v34 }
  0xb6   :  { %v2070_v12 = vpop.permute.xlu1 %349 }
  0xb7   :  { %v663_v58 = vrot.slane %v657_v54, 4 }
  0xb8   :  { %v2090_v27 = vpop.permute.xlu0 %648 }
  0xba   :  { %v2072_v13 = vpop.permute.xlu1 %610 }
  0xbb   :  { %v618_v14 = vmul.f32 0.0, %v2072_v13 }
  0xbc   :  { %v2093_v32 = vpop.permute.xlu0 %351 }
  0xbd   :  { %v621_v15 = vpack.c.bf16 %v618_v14, %v618_v14  ;;  %v360_v44 = vmul.f32 0.0, %v2093_v32 }
  0xbf   :  { %627 = vrot.lane.b32.xlu0 %v621_v15, %s1847_s26  ;;  %v363_v48 = vpack.c.bf16 %v360_v44, %v360_v44  ;;  %v2124_v15 = vpop.permute.xlu1 %691  ;;  %v2144_v44 = vld [vmem:[#allocation2 + $0x10] sm:$0xff] }
  0xc0   :  { %v2100_v37 = vpop.permute.xlu0 %612 }
  0xc3   :  { %v2126_v16 = vpop.permute.xlu1 %430 }
  0xc4   :  { %v2105_v47 = vpop.permute.xlu0 %693 }
  0xc5   :  { %v701_v55 = vmul.f32 0.0, %v2105_v47 }
  0xc7   :  { %v704_v1 = vpack.c.bf16 %v701_v55, %v701_v55  ;;  %v2128_v17 = vpop.permute.xlu1 %766 }
  0xc8   :  { %v2110_v53 = vpop.permute.xlu0 %432 }
  0xc9   :  { %v441_v57 = vmul.f32 0.0, %v2110_v53  ;;  %v710_v10 = vrot.slane %v704_v1, 4 }
  0xcb   :  { %v444_v5 = vpack.c.bf16 %v441_v57, %v441_v57 }
  0xcc   :  { %v2115_v59 = vpop.permute.xlu0 %768 }
  0xd0   :  { %v2118_v6 = vpop.permute.xlu0 %732 }
  0xd1   :  { %v740_v8 = vmul.f32 0.0, %v2118_v6 }
  0xd3   :  { %v743_v14 = vpack.c.bf16 %v740_v8, %v740_v8 }
  0xd7   :  { %503 = vadd.xlane.f32.xlu1 %v502_v25 }
  0xe8   :  { %805 = vrot.lane.b32.xlu1 %v2004_v28, %s1848_s10  ;;  %v402_v28 = vpack.c.bf16 %v399_v41, %v399_v41 }
  0xea   :  { %v408_v52 = vrot.slane %v402_v28, 4 }
  0xec   :  { %157 = vrot.lane.b32.xlu1 %v151_v36, %s1848_s10 }
  0xf0   :  { %238 = vrot.lane.b32.xlu1 %v232_v40, %s1847_s26  ;;  %v2142_v40 = vld [vmem:[#allocation2 + $0x8] sm:$0xff] }
  0xf4   :  { %591 = vrot.lane.b32.xlu1 %v588_v45, %s1846_s19 }
  0xf8   :  { %371 = vrot.lane.b32.xlu1 %v363_v48, %s1844_s11 }
  0xfc   :  { %413 = vrot.lane.b32.xlu1 %v408_v52, %s1841_s15  ;;  %v225_v52 = vsel %vm224_vm4, %v2044_v56, %v2052_v62 }
 0x100   :  { %666 = vrot.lane.b32.xlu1 %v663_v58, %s1845_s0 }
 0x104   :  { %452 = vrot.lane.b32.xlu1 %v444_v5, %s1842_s20 }
 0x108   :  { %715 = vrot.lane.b32.xlu1 %v710_v10, %s1843_s25 }
 0x10c   :  { %751 = vrot.lane.b32.xlu1 %v743_v14, %s1844_s11 }
 0x12f   :  { %v84_v19 = vpop.xlane.xlu1 %83 }
 0x130   :  { %v85_v20 = vmul.f32 0.00390625, %v84_v19 }
 0x132   :  { %v86_v22 = vadd.f32 1e-05, %v85_v20 }
 0x134   :  { %1830 = vrsqrt.f32 %v86_v22 }
 0x13e   :  { %v1831_v23 = vpop.eup %1830 }
 0x13f   :  { %v95_v25 = vrot.slane %v1831_v23, %v2030_v43 }
 0x141   :  { %v97_v33 = vmul.f32 %v95_v25, %v2037_v50 }
 0x143   :  { %v110_v36 = vmul.f32 %v2133_v29, %v97_v33 }
 0x145   :  { %v123_v38 = vadd.f32 %v2138_v35, %v110_v36 }
 0x147   :  { %vm124_vm1 = vcmp.gt.f32.partialorder %v123_v38, 0.0  ;;  %v125_v41 = vmul.f32 0.01, %v123_v38 }
 0x149   :  { %v126_v45 = vsel %vm124_vm1, %v123_v38, %v125_v41  ;;  %v2182_v38 = vpop.permute.xlu1 %730 }
 0x14a   :  { %v128_v28 = vcombine.high %v126_v45, %v126_v45  ;;  %130 = vst [vmem:[#allocation2 + $0x8] sm:$0xf] %v126_v45  ;;  %v312_v45 = vsel %vm286_vm7, %v2050_v61, %v2056_v0 }
 0x14c   :  { %131 = vst [vmem:[#allocation2 + $0x10] sm:$0xf] %v128_v28  ;;  %v49_v28 = vpack.c.bf16 %v2142_v40, %v2142_v40 }
 0x151   :  { %v293_v50 = vld [vmem:[#allocation2 + $0x8] sm:$0xff] }
 0x152   :  { %v358_v60 = vmul.f32 %v2070_v12, %v293_v50  ;;  %v149_v48 = vmul.f32 %v293_v50, %v144_v30  ;;  %466 = vst [vmem:[#allocation2 + $0x8] sm:$0xf] %v1912_v4  ;;  %v439_v55 = vmul.f32 %v2126_v16, %v293_v50  ;;  %v230_v58 = vmul.f32 %v293_v50, %v225_v52 }
 0x153   :  { %v2157_v54 = vld [vmem:[#allocation2 + $0x10] sm:$0xff]  ;;  %v188_v1 = vmul.f32 %v293_v50, %v183_v49  ;;  %v264_v4 = vsel %vm263_vm5, %v2032_v46, %v2039_v51  ;;  %v295_v14 = vpack.c.bf16 %v293_v50, %v293_v50  ;;  %v316_v46 = vmul.f32 %v2050_v61, %v293_v50 }
 0x154   :  { %v361_v39 = vpack.c.bf16 %v358_v60, %v358_v60  ;;  %v152_v57 = vpack.c.bf16 %v149_v48, %v149_v48  ;;  %467 = vst [vmem:[#allocation2 + $0x10] sm:$0xf] %v1922_v7  ;;  %v269_v31 = vmul.f32 %v293_v50, %v264_v4  ;;  %v442_v56 = vpack.c.bf16 %v439_v55, %v439_v55 }
 0x155   :  { %v233_v5 = vpack.c.bf16 %v230_v58, %v230_v58  ;;  %v191_v8 = vpack.c.bf16 %v188_v1, %v188_v1  ;;  %v150_v10 = vmul.f32 %v2157_v54, %v2028_v42  ;;  %v296_v7 = vpack.c.bf16 %v2157_v54, %v2157_v54  ;;  %297 = vst [vmem:[#allocation3 + $0x40] sm:$0xf] %v295_v14 }
 0x156   :  { %367 = vrot.lane.b32.xlu0 %v361_v39, %s1844_s11  ;;  %159 = vrot.lane.b32.xlu1 %v152_v57, %s1848_s10  ;;  %v272_v22 = vpack.c.bf16 %v269_v31, %v269_v31  ;;  %v231_v23 = vmul.f32 %v2157_v54, %v2052_v62  ;;  %v354_v42 = vsel %vm244_vm6, %v2070_v12, %v2093_v32  ;;  %v53_v49 = vrot.slane %v49_v28, 4 }
 0x157   :  { %v197_v19 = vrot.slane %v191_v8, 4  ;;  %v153_v20 = vpack.c.bf16 %v150_v10, %v150_v10  ;;  %298 = vst [vmem:[#allocation3 + $0x48] sm:$0xf] %v296_v7  ;;  %v319_v25 = vpack.c.bf16 %v316_v46, %v316_v46  ;;  %v359_v33 = vmul.f32 %v354_v42, %v2157_v54 }
 0x158   :  { %v397_v36 = vmul.f32 %v2062_v9, %v293_v50  ;;  %v278_v62 = vrot.slane %v272_v22, 4  ;;  %v234_v41 = vpack.c.bf16 %v231_v23, %v231_v23  ;;  %v435_v12 = vsel %vm163_vm8, %v2126_v16, %v2110_v53  ;;  %57 = vst [vmem:[#allocation3 + $0x80] sm:$0xf0] %v53_v49 }
 0x159   :  { %v50_v32 = vpack.c.bf16 %v2144_v44, %v2144_v44  ;;  %v325_v30 = vrot.slane %v319_v25, 4  ;;  %v362_v50 = vpack.c.bf16 %v359_v33, %v359_v33  ;;  %v440_v48 = vmul.f32 %v435_v12, %v2157_v54  ;;  %v2218_v46 = vld [vmem:[#allocation2 + $0x8] sm:$0xff] }
 0x15a   :  { %448 = vrot.lane.b32.xlu0 %v442_v56, %s1842_s20  ;;  %240 = vrot.lane.b32.xlu1 %v233_v5, %s1847_s26  ;;  %v400_v60 = vpack.c.bf16 %v397_v36, %v397_v36  ;;  %v317_v0 = vmul.f32 %v312_v45, %v2157_v54  ;;  %v189_v53 = vmul.f32 %v2157_v54, %v2023_v34 }
 0x15b   :  { %v54_v16 = vrot.slane %v50_v32, 4  ;;  %v443_v55 = vpack.c.bf16 %v440_v48, %v440_v48  ;;  %v270_v58 = vmul.f32 %v2157_v54, %v2039_v51  ;;  %v393_v34 = vsel %vm205_vm9, %v2062_v9, %v2088_v26 }
 0x15c   :  { %v406_v44 = vrot.slane %v400_v60, 4  ;;  %v320_v39 = vpack.c.bf16 %v317_v0, %v317_v0  ;;  %v192_v57 = vpack.c.bf16 %v189_v53, %v189_v53  ;;  %v398_v56 = vmul.f32 %v393_v34, %v2157_v54 }
 0x15d   :  { %58 = vst [vmem:[#allocation3 + $0x88] sm:$0xf0] %v54_v16  ;;  %v273_v31 = vpack.c.bf16 %v270_v58, %v270_v58  ;;  %v650_v23 = vsel %vm263_vm5, %v2065_v11, %v2090_v27  ;;  %v776_v16 = vmul.f32 0.0, %v2115_v59 }
 0x15e   :  { %201 = vrot.lane.b32.xlu1 %v197_v19, %s1846_s19  ;;  %161 = vrot.lane.b32.xlu0 %v153_v20, %s1848_s10  ;;  %v326_v1 = vrot.slane %v320_v39, 4  ;;  %v198_v4 = vrot.slane %v192_v57, 4  ;;  %v401_v51 = vpack.c.bf16 %v398_v56, %v398_v56  ;;  %v2220_v20 = vld [vmem:[#allocation2 + $0x10] sm:$0xff] }
 0x15f   :  { %v279_v5 = vrot.slane %v273_v31, 4 }
 0x160   :  { %v407_v7 = vrot.slane %v401_v51, 4  ;;  %v808_v51 = vpop.permute.xlu0 %807 }
 0x162   :  { %282 = vrot.lane.b32.xlu1 %v278_v62, %s1845_s0  ;;  %242 = vrot.lane.b32.xlu0 %v234_v41, %s1847_s26 }
 0x164   :  { %v504_v61 = vpop.xlane.xlu1 %503 }
 0x165   :  { %v505_v52 = vmul.f32 0.00390625, %v504_v61 }
 0x166   :  { %328 = vrot.lane.b32.xlu1 %v325_v30, %s1843_s25  ;;  %369 = vrot.lane.b32.xlu0 %v362_v50, %s1844_s11  ;;  %v734_v50 = vsel %vm244_vm6, %v2182_v38, %v2118_v6 }
 0x167   :  { %v506_v40 = vadd.f32 1e-05, %v505_v52 }
 0x168   :  { %v2250_v30 = vpop.permute.xlu1 %805 }
 0x169   :  { %1832 = vrsqrt.f32 %v506_v40 }
 0x16a   :  { %409 = vrot.lane.b32.xlu1 %v406_v44, %s1841_s15  ;;  %450 = vrot.lane.b32.xlu0 %v443_v55, %s1842_s20 }
 0x16c   :  { %v2269_v49 = vpop.permute.xlu1 %157 }
 0x16e   :  { %330 = vrot.lane.b32.xlu1 %v326_v1, %s1843_s25  ;;  %203 = vrot.lane.b32.xlu0 %v198_v4, %s1846_s19 }
 0x170   :  { %v2281_v4 = vpop.permute.xlu1 %238 }
 0x172   :  { %284 = vrot.lane.b32.xlu0 %v279_v5, %s1845_s0 }
 0x173   :  { %v1833_v8 = vpop.eup %1832 }
 0x174   :  { %v515_v10 = vrot.slane %v1833_v8, %v2030_v43  ;;  %v575_v43 = vsel %vm182_vm3, %v2054_v63, %v2082_v21  ;;  %v815_v8 = vmul.f32 0.0, %v808_v51 }
 0x176   :  { %v517_v14 = vmul.f32 %v515_v10, %v2078_v18  ;;  %411 = vrot.lane.b32.xlu0 %v407_v7, %s1841_s15  ;;  %v539_v18 = vsel %vm143_vm2, %v2059_v3, %v2086_v24  ;;  %v2291_v10 = vpop.permute.xlu1 %591 }
 0x178   :  { %v518_v9 = vmul.f32 %v517_v14, %v2133_v29  ;;  %v614_v29 = vsel %vm224_vm4, %v2072_v13, %v2100_v37 }
 0x17a   :  { %v519_v26 = vadd.f32 %v518_v9, %v2138_v35 }
 0x17c   :  { %vm520_vm10 = vcmp.gt.f32.partialorder %v519_v26, 0.0  ;;  %v521_v54 = vmul.f32 0.01, %v519_v26 }
 0x17e   :  { %v522_v19 = vsel %vm520_vm10, %v519_v26, %v521_v54  ;;  %v471_v26 = vpack.c.bf16 %v2220_v20, %v2220_v20 }
 0x17f   :  { %v524_v22 = vcombine.high %v522_v19, %v522_v19  ;;  %526 = vst [vmem:[#allocation2 + $0x8] sm:$0xf] %v522_v19 }
 0x181   :  { %527 = vst [vmem:[#allocation2 + $0x10] sm:$0xf] %v524_v22  ;;  %v2300_v22 = vpop.permute.xlu1 %371 }
 0x186   :  { %v2231_v35 = vld [vmem:[#allocation2 + $0x8] sm:$0xff] }
 0x187   :  { %v544_v42 = vmul.f32 %v2231_v35, %v539_v18  ;;  %v619_v25 = vmul.f32 %v2231_v35, %v614_v29  ;;  %v580_v63 = vmul.f32 %v2231_v35, %v575_v43  ;;  %v655_v3 = vmul.f32 %v2231_v35, %v650_v23  ;;  %v40_v18 = vld [vmem:[%s2838_s7] sm:$0xf] }
 0x188   :  { %v2239_v33 = vld [vmem:[#allocation2 + $0x10] sm:$0xff]  ;;  %v699_v11 = vmul.f32 %v2231_v35, %v2124_v15  ;;  %v738_v39 = vmul.f32 %v2231_v35, %v2182_v38  ;;  %v774_v34 = vmul.f32 %v2231_v35, %v2128_v17  ;;  %v475_v43 = vrot.slane %v471_v26, 4 }
 0x189   :  { %v547_v36 = vpack.c.bf16 %v544_v42, %v544_v42  ;;  %v622_v62 = vpack.c.bf16 %v619_v25, %v619_v25  ;;  %v583_v41 = vpack.c.bf16 %v580_v63, %v580_v63  ;;  %v545_v13 = vmul.f32 %v2086_v24, %v2239_v33  ;;  %v2312_v25 = vpop.permute.xlu1 %413 }
 0x18a   :  { %v620_v32 = vmul.f32 %v2100_v37, %v2239_v33  ;;  %v658_v28 = vpack.c.bf16 %v655_v3, %v655_v3  ;;  %v681_v24 = vpack.c.bf16 %v2239_v33, %v2239_v33  ;;  %v702_v60 = vpack.c.bf16 %v699_v11, %v699_v11  ;;  %479 = vst [vmem:[#allocation3 + $0x98] sm:$0xf0] %v475_v43  ;;  %v200_v3 = vpop.permute.xlu0 %199 }
 0x18b   :  { %554 = vrot.lane.b32.xlu1 %v547_v36, %s1848_s10  ;;  %629 = vrot.lane.b32.xlu0 %v622_v62, %s1847_s26  ;;  %v589_v45 = vrot.slane %v583_v41, 4  ;;  %v548_v12 = vpack.c.bf16 %v545_v13, %v545_v13  ;;  %v739_v48 = vmul.f32 %v734_v50, %v2239_v33  ;;  %v680_v37 = vpack.c.bf16 %v2231_v35, %v2231_v35  ;;  %v1784_v36 = vld [vmem:[%s2836_s1 + $0x18] sm:$0xff]  ;;  %v986_v13 = vld [vmem:[%s2836_s1] sm:$0xff] }
 0x18c   :  { %v623_v61 = vpack.c.bf16 %v620_v32, %v620_v32  ;;  %v664_v0 = vrot.slane %v658_v28, 4  ;;  %v656_v53 = vmul.f32 %v2090_v27, %v2239_v33  ;;  %v581_v6 = vmul.f32 %v2082_v21, %v2239_v33  ;;  %683 = vst [vmem:[#allocation3 + $0x58] sm:$0xf] %v681_v24  ;;  %v1787_v28 = vld [vmem:[%s2836_s1 + $0x30] sm:$0xff]  ;;  %v1788_v24 = vld [vmem:[%s2836_s1 + $0x38] sm:$0xff] }
 0x18d   :  { %682 = vst [vmem:[#allocation3 + $0x50] sm:$0xf] %v680_v37  ;;  %v708_v52 = vrot.slane %v702_v60, 4  ;;  %v742_v40 = vpack.c.bf16 %v739_v48, %v739_v48  ;;  %v695_v21 = vsel %vm286_vm7, %v2124_v15, %v2105_v47  ;;  %v779_v27 = vpack.c.bf16 %v776_v16, %v776_v16 }
 0x18e   :  { %v659_v44 = vpack.c.bf16 %v656_v53, %v656_v53  ;;  %v584_v55 = vpack.c.bf16 %v581_v6, %v581_v6  ;;  %v700_v1 = vmul.f32 %v695_v21, %v2239_v33  ;;  %v770_v47 = vsel %vm205_vm9, %v2128_v17, %v2115_v59  ;;  %v281_v62 = vpop.permute.xlu0 %280 }
 0x18f   :  { %593 = vrot.lane.b32.xlu1 %v589_v45, %s1846_s19  ;;  %556 = vrot.lane.b32.xlu0 %v548_v12, %s1848_s10  ;;  %v785_v15 = vrot.slane %v779_v27, 4  ;;  %v741_v31 = vpack.c.bf16 %v738_v39, %v738_v39  ;;  %v777_v38 = vpack.c.bf16 %v774_v34, %v774_v34  ;;  %v775_v5 = vmul.f32 %v770_v47, %v2239_v33  ;;  %v987_v12 = vld [vmem:[%s2836_s1 + $0x8] sm:$0xff] }
 0x190   :  { %v665_v57 = vrot.slane %v659_v44, 4  ;;  %v590_v58 = vrot.slane %v584_v55, 4  ;;  %v703_v56 = vpack.c.bf16 %v700_v1, %v700_v1  ;;  %v809_v59 = vsel %vm163_vm8, %v2250_v30, %v808_v51 }
 0x191   :  { %v783_v7 = vrot.slane %v777_v38, 4  ;;  %v778_v9 = vpack.c.bf16 %v775_v5, %v775_v5  ;;  %v818_v17 = vpack.c.bf16 %v815_v8, %v815_v8  ;;  %v814_v19 = vmul.f32 %v809_v59, %v2239_v33  ;;  %v39_v33 = vld [vmem:[%s2839_s6] sm:$0xf] }
 0x192   :  { %v709_v14 = vrot.slane %v703_v56, 4  ;;  %v470_v29 = vpack.c.bf16 %v2218_v46, %v2218_v46  ;;  %v813_v20 = vmul.f32 %v2250_v30, %v2231_v35  ;;  %v2318_v46 = vpop.permute.xlu1 %666  ;;  %v1783_v35 = vld [vmem:[%s2836_s1 + $0x10] sm:$0xff]  ;;  %v333_v11 = vpop.permute.xlu0 %332 }
 0x193   :  { %631 = vrot.lane.b32.xlu1 %v623_v61, %s1847_s26  ;;  %668 = vrot.lane.b32.xlu0 %v664_v0, %s1845_s0  ;;  %v784_v54 = vrot.slane %v778_v9, 4  ;;  %v817_v23 = vpack.c.bf16 %v814_v19, %v814_v19 }
 0x194   :  { %v474_v42 = vrot.slane %v470_v29, 4  ;;  %v816_v63 = vpack.c.bf16 %v813_v20, %v813_v20 }
 0x196   :  { %478 = vst [vmem:[#allocation3 + $0x90] sm:$0xf0] %v474_v42  ;;  %v453_v41 = vpop.permute.xlu1 %452  ;;  %v2341_v32 = vpop.permute.xlu0 %552 }
 0x197   :  { %711 = vrot.lane.b32.xlu1 %v708_v52, %s1843_s25  ;;  %749 = vrot.lane.b32.xlu0 %v742_v40, %s1844_s11 }
 0x19a   :  { %v2334_v45 = vpop.permute.xlu1 %715  ;;  %v2350_v50 = vpop.permute.xlu0 %627 }
 0x19b   :  { %670 = vrot.lane.b32.xlu1 %v665_v57, %s1845_s0  ;;  %595 = vrot.lane.b32.xlu0 %v590_v58, %s1846_s19 }
 0x19e   :  { %v2346_v30 = vpop.permute.xlu1 %751 }
 0x19f   :  { %790 = vrot.lane.b32.xlu1 %v785_v15, %s1841_s15  ;;  %747 = vrot.lane.b32.xlu0 %v741_v31, %s1844_s11 }
 0x1a3   :  { %786 = vrot.lane.b32.xlu1 %v783_v7, %s1841_s15  ;;  %713 = vrot.lane.b32.xlu0 %v709_v14, %s1843_s25 }
 0x1a7   :  { %826 = vrot.lane.b32.xlu1 %v818_v17, %s1842_s20  ;;  %788 = vrot.lane.b32.xlu0 %v784_v54, %s1841_s15 }
 0x1ab   :  { %970 = vperm.xlu1 %1827, %v40_v18   ;;  %824 = vrot.lane.b32.xlu0 %v817_v23, %s1842_s20  ;;  %v2381_v23 = vld [vmem:[%s2840_s2] sm:$0x3] }
 0x1af   :  { %822 = vrot.lane.b32.xlu0 %v816_v63, %s1842_s20  ;;  %1026 = vrot.lane.b32.xlu1 %v1783_v35, %s1841_s15 }
 0x1b3   :  { %963 = vperm.xlu0 %1826, %v39_v33   ;;  %1364 = vrot.lane.b32.xlu1 %v1783_v35, %s1841_s15 }
 0x1b7   :  { %1028 = vrot.lane.b32.xlu0 %v1784_v36, %s1841_s15  ;;  %990 = vrot.lane.b32.xlu1 %v986_v13, %s1842_s20 }
 0x1bb   :  { %1366 = vrot.lane.b32.xlu0 %v1784_v36, %s1841_s15  ;;  %1328 = vrot.lane.b32.xlu1 %v986_v13, %s1842_s20 }
 0x1bf   :  { %992 = vrot.lane.b32.xlu0 %v987_v12, %s1842_s20  ;;  %1101 = vrot.lane.b32.xlu1 %v1787_v28, %s1843_s25 }
 0x1c3   :  { %1330 = vrot.lane.b32.xlu0 %v987_v12, %s1842_s20  ;;  %1439 = vrot.lane.b32.xlu1 %v1787_v28, %s1843_s25 }
 0x1c7   :  { %1103 = vrot.lane.b32.xlu0 %v1788_v24, %s1843_s25 }
 0x1c8   :  { %v160_v60 = vpop.permute.xlu1 %159  ;;  %v368_v48 = vpop.permute.xlu0 %367 }
 0x1c9   :  { %v164_v37 = vsel %vm163_vm8, %v2269_v49, %v160_v60 }
 0x1ca   :  { %168 = vst [vmem:[#allocation3] sm:$0xf] %v164_v37 }
 0x1cb   :  { %1441 = vrot.lane.b32.xlu0 %v1788_v24, %s1843_s25 }
 0x1cc   :  { %v241_v61 = vpop.permute.xlu1 %240  ;;  %v449_v0 = vpop.permute.xlu0 %448 }
 0x1cd   :  { %v245_v53 = vsel %vm244_vm6, %v2281_v4, %v241_v61 }
 0x1ce   :  { %249 = vst [vmem:[#allocation3 + $0x20] sm:$0xf] %v245_v53 }
 0x1d0   :  { %v202_v6 = vpop.permute.xlu1 %201  ;;  %v162_v16 = vpop.permute.xlu0 %161 }
 0x1d1   :  { %v206_v52 = vsel %vm205_vm9, %v200_v3, %v202_v6  ;;  %v165_v40 = vsel %vm163_vm8, %v160_v60, %v162_v16 }
 0x1d2   :  { %210 = vst [vmem:[#allocation3] sm:$0xf0] %v206_v52  ;;  %169 = vst [vmem:[#allocation3 + $0x8] sm:$0xf] %v165_v40 }
 0x1d4   :  { %v283_v44 = vpop.permute.xlu1 %282  ;;  %v243_v55 = vpop.permute.xlu0 %242 }
 0x1d5   :  { %v287_v49 = vsel %vm286_vm7, %v281_v62, %v283_v44  ;;  %v246_v21 = vsel %vm244_vm6, %v241_v61, %v243_v55 }
 0x1d6   :  { %291 = vst [vmem:[#allocation3 + $0x20] sm:$0xf0] %v287_v49  ;;  %250 = vst [vmem:[#allocation3 + $0x28] sm:$0xf] %v246_v21 }
 0x1d8   :  { %v329_v27 = vpop.permute.xlu1 %328  ;;  %v370_v39 = vpop.permute.xlu0 %369 }
 0x1d9   :  { %v374_v57 = vsel %vm224_vm4, %v368_v48, %v370_v39  ;;  %v375_v58 = vsel %vm224_vm4, %v370_v39, %v2300_v22  ;;  %v835_v17 = vld [vmem:[#allocation3] sm:$0xff] }
 0x1da   :  { %378 = vst [vmem:[#allocation3 + $0x60] sm:$0xf] %v374_v57  ;;  %379 = vst [vmem:[#allocation3 + $0x68] sm:$0xf] %v375_v58 }
 0x1dc   :  { %v410_v34 = vpop.permute.xlu1 %409  ;;  %v451_v1 = vpop.permute.xlu0 %450 }
 0x1dd   :  { %v455_v4 = vsel %vm143_vm2, %v449_v0, %v451_v1  ;;  %v456_v47 = vsel %vm143_vm2, %v451_v1, %v453_v41  ;;  %v839_v54 = vld [vmem:[#allocation3 + $0x20] sm:$0xff] }
 0x1de   :  { %459 = vst [vmem:[#allocation3 + $0x80] sm:$0xf] %v455_v4  ;;  %460 = vst [vmem:[#allocation3 + $0x88] sm:$0xf] %v456_v47 }
 0x1e0   :  { %v331_v15 = vpop.permute.xlu1 %330  ;;  %v204_v31 = vpop.permute.xlu0 %203 }
 0x1e1   :  { %v335_v38 = vsel %vm263_vm5, %v329_v27, %v331_v15  ;;  %v336_v56 = vsel %vm263_vm5, %v331_v15, %v333_v11  ;;  %v207_v5 = vsel %vm205_vm9, %v202_v6, %v204_v31 }
 0x1e2   :  { %339 = vst [vmem:[#allocation3 + $0x40] sm:$0xf0] %v335_v38  ;;  %340 = vst [vmem:[#allocation3 + $0x48] sm:$0xf0] %v336_v56  ;;  %v1786_v38 = vld [vmem:[%s2836_s1 + $0x28] sm:$0xff] }
 0x1e3   :  { %211 = vst [vmem:[#allocation3 + $0x8] sm:$0xf0] %v207_v5  ;;  %1067 = vrot.lane.b32.xlu0 %v1786_v38, %s1844_s11 }
 0x1e4   :  { %v285_v51 = vpop.permute.xlu0 %284 }
 0x1e5   :  { %v288_v8 = vsel %vm286_vm7, %v283_v44, %v285_v51  ;;  %v852_v29 = vld [vmem:[#allocation3 + $0x88] sm:$0xff]  ;;  %v851_v20 = vld [vmem:[#allocation3 + $0x80] sm:$0xff] }
 0x1e6   :  { %292 = vst [vmem:[#allocation3 + $0x28] sm:$0xf0] %v288_v8 }
 0x1e8   :  { %v412_v7 = vpop.permute.xlu0 %411 }
 0x1e9   :  { %v416_v14 = vsel %vm182_vm3, %v410_v34, %v412_v7  ;;  %v417_v9 = vsel %vm182_vm3, %v412_v7, %v2312_v25  ;;  %v844_v19 = vld [vmem:[#allocation3 + $0x48] sm:$0xff]  ;;  %v843_v22 = vld [vmem:[#allocation3 + $0x40] sm:$0xff] }
 0x1ea   :  { %v836_v59 = vld [vmem:[#allocation3 + $0x8] sm:$0xff]  ;;  %420 = vst [vmem:[#allocation3 + $0x60] sm:$0xf0] %v416_v14  ;;  %421 = vst [vmem:[#allocation3 + $0x68] sm:$0xf0] %v417_v9 }
 0x1eb   :  { %859 = vmatprep.subr.bf16.mxu0 %v836_v59  ;;  %v1789_v59 = vld [vmem:[%s2836_s1 + $0x50] sm:$0xff] }
 0x1ec   :  { %860 = vmatpush1.bf16.msra.mxu0 %v835_v17  ;;  %v1793_v17 = vld [vmem:[%s2836_s1 + $0x70] sm:$0xff] }
 0x1ed   :  { %v840_v26 = vld [vmem:[#allocation3 + $0x28] sm:$0xff] }
 0x1ee   :  { %861 = vmatprep.subr.bf16.mxu0 %v840_v26  ;;  %v1791_v26 = vld [vmem:[%s2836_s1 + $0x60] sm:$0xff] }
 0x1f0   :  { %862 = vmatpush1.bf16.msra.mxu0 %v839_v54 }
 0x1f1   :  { %863 = vmatprep.subr.bf16.mxu0 %v844_v19  ;;  %v848_v43 = vld [vmem:[#allocation3 + $0x68] sm:$0xff]  ;;  %v847_v18 = vld [vmem:[#allocation3 + $0x60] sm:$0xff] }
 0x1f4   :  { %864 = vmatpush1.bf16.msra.mxu0 %v843_v22 }
 0x1f5   :  { %865 = vmatprep.subr.bf16.mxu0 %v848_v43 }
 0x1f8   :  { %866 = vmatpush1.bf16.msra.mxu0 %v847_v18 }
 0x1f9   :  { %867 = vmatprep.subr.bf16.mxu0 %v852_v29 }
 0x1fc   :  { %868 = vmatpush1.bf16.msra.mxu0 %v851_v20 }
 0x1fd   :  { %v555_v42 = vpop.permute.xlu1 %554  ;;  %v630_v25 = vpop.permute.xlu0 %629 }
 0x1fe   :  { %v558_v63 = vsel %vm163_vm8, %v2341_v32, %v555_v42  ;;  %v633_v33 = vsel %vm244_vm6, %v2350_v50, %v630_v25 }
 0x1ff   :  { %1781 = vmatmul.mubr.msk.bf16.vlgmr.msra.gmra.mrb[0].mxu0 %vm855_vm11, %v2381_v23  ;;  %562 = vst [vmem:[#allocation3 + $0x10] sm:$0xf] %v558_v63  ;;  %637 = vst [vmem:[#allocation3 + $0x30] sm:$0xf] %v633_v33  ;;  %v1792_v63 = vld [vmem:[%s2836_s1 + $0x68] sm:$0xff] }
 0x200   :  { %1689 = vmatprep.mubr.bf16.mxu0 %v1840_v2 }
 0x201   :  { %v594_v3 = vpop.permute.xlu1 %593  ;;  %v557_v35 = vpop.permute.xlu0 %556 }
 0x202   :  { %v597_v36 = vsel %vm205_vm9, %v2291_v10, %v594_v3  ;;  %v559_v62 = vsel %vm163_vm8, %v555_v42, %v557_v35  ;;  %v1790_v42 = vld [vmem:[%s2836_s1 + $0x58] sm:$0xff] }
 0x203   :  { %601 = vst [vmem:[#allocation3 + $0x10] sm:$0xf0] %v597_v36  ;;  %563 = vst [vmem:[#allocation3 + $0x18] sm:$0xf] %v559_v62 }
 0x205   :  { %v632_v41 = vpop.permute.xlu1 %631  ;;  %v669_v13 = vpop.permute.xlu0 %668 }
 0x206   :  { %v634_v11 = vsel %vm244_vm6, %v630_v25, %v632_v41  ;;  %v672_v12 = vsel %vm286_vm7, %v2318_v46, %v669_v13  ;;  %v1794_v25 = vld [vmem:[%s2836_s1 + $0x78] sm:$0xff] }
 0x207   :  { %638 = vst [vmem:[#allocation3 + $0x38] sm:$0xf] %v634_v11  ;;  %676 = vst [vmem:[#allocation3 + $0x30] sm:$0xf0] %v672_v12 }
 0x209   :  { %v712_v32 = vpop.permute.xlu1 %711  ;;  %v750_v28 = vpop.permute.xlu0 %749 }
 0x20a   :  { %v754_v50 = vsel %vm224_vm4, %v750_v28, %v2346_v30  ;;  %v837_v52 = vld [vmem:[#allocation3 + $0x10] sm:$0xff] }
 0x20b   :  { %758 = vst [vmem:[#allocation3 + $0x78] sm:$0xf] %v754_v50 }
 0x20d   :  { %v671_v10 = vpop.permute.xlu1 %670  ;;  %v596_v24 = vpop.permute.xlu0 %595 }
 0x20e   :  { %v673_v60 = vsel %vm286_vm7, %v669_v13, %v671_v10  ;;  %v598_v48 = vsel %vm205_vm9, %v594_v3, %v596_v24  ;;  %v841_v27 = vld [vmem:[#allocation3 + $0x30] sm:$0xff] }
 0x20f   :  { %677 = vst [vmem:[#allocation3 + $0x38] sm:$0xf0] %v673_v60  ;;  %602 = vst [vmem:[#allocation3 + $0x18] sm:$0xf0] %v598_v48 }
 0x211   :  { %v791_v37 = vpop.permute.xlu1 %790  ;;  %v748_v61 = vpop.permute.xlu0 %747 }
 0x212   :  { %v753_v46 = vsel %vm224_vm4, %v748_v61, %v750_v28 }
 0x213   :  { %757 = vst [vmem:[#allocation3 + $0x70] sm:$0xf] %v753_v46 }
 0x215   :  { %v714_v0 = vpop.permute.xlu0 %713  ;;  %v787_v16 = vpop.permute.xlu1 %786 }
 0x216   :  { %v717_v53 = vsel %vm263_vm5, %v712_v32, %v714_v0  ;;  %v718_v30 = vsel %vm263_vm5, %v714_v0, %v2334_v45  ;;  %v838_v6 = vld [vmem:[#allocation3 + $0x18] sm:$0xff] }
 0x217   :  { %721 = vst [vmem:[#allocation3 + $0x50] sm:$0xf0] %v717_v53  ;;  %722 = vst [vmem:[#allocation3 + $0x58] sm:$0xf0] %v718_v30  ;;  %900 = vmatprep.subr.bf16.mxu1 %v838_v6  ;;  %v842_v40 = vld [vmem:[#allocation3 + $0x38] sm:$0xff]  ;;  %v1796_v30 = vld [vmem:[%s2836_s1 + $0x88] sm:$0xff] }
 0x218   :  { %901 = vmatpush1.bf16.msra.mxu1 %v837_v52  ;;  %v2503_v6 = vld [vmem:[#allocation2] sm:$0xff] }
 0x219   :  { %902 = vmatprep.subr.bf16.mxu1 %v842_v40  ;;  %v789_v44 = vpop.permute.xlu0 %788  ;;  %v827_v21 = vpop.permute.xlu1 %826 }
 0x21a   :  { %v792_v55 = vsel %vm182_vm3, %v787_v16, %v789_v44  ;;  %v793_v49 = vsel %vm182_vm3, %v789_v44, %v791_v37 }
 0x21b   :  { %796 = vst [vmem:[#allocation3 + $0x70] sm:$0xf0] %v792_v55  ;;  %797 = vst [vmem:[#allocation3 + $0x78] sm:$0xf0] %v793_v49 }
 0x21c   :  { %903 = vmatpush1.bf16.msra.mxu1 %v841_v27 }
 0x21d   :  { %v825_v45 = vpop.permute.xlu0 %824 }
 0x21e   :  { %v829_v39 = vsel %vm143_vm2, %v825_v45, %v827_v21  ;;  %v846_v57 = vld [vmem:[#allocation3 + $0x58] sm:$0xff]  ;;  %v845_v58 = vld [vmem:[#allocation3 + $0x50] sm:$0xff] }
 0x21f   :  { %833 = vst [vmem:[#allocation3 + $0x98] sm:$0xf] %v829_v39  ;;  %904 = vmatprep.subr.bf16.mxu1 %v846_v57 }
 0x220   :  { %905 = vmatpush1.bf16.msra.mxu1 %v845_v58 }
 0x221   :  { %v823_v34 = vpop.permute.xlu0 %822 }
 0x222   :  { %v828_v1 = vsel %vm143_vm2, %v823_v34, %v825_v45  ;;  %v850_v4 = vld [vmem:[#allocation3 + $0x78] sm:$0xff]  ;;  %v849_v47 = vld [vmem:[#allocation3 + $0x70] sm:$0xff] }
 0x223   :  { %832 = vst [vmem:[#allocation3 + $0x90] sm:$0xf] %v828_v1  ;;  %906 = vmatprep.subr.bf16.mxu1 %v850_v4 }
 0x224   :  { %907 = vmatpush1.bf16.msra.mxu1 %v849_v47 }
 0x226   :  { %v854_v15 = vld [vmem:[#allocation3 + $0x98] sm:$0xff] }
 0x227   :  { %908 = vmatprep.subr.bf16.mxu1 %v854_v15 }
 0x22a   :  { %v853_v31 = vld [vmem:[#allocation3 + $0x90] sm:$0xff]  ;;  %v2465_v33 = vpop.permute.xlu1 %970 }
 0x22b   :  { %909 = vmatpush1.bf16.msra.mxu1 %v853_v31 }
 0x22e   :  { %1782 = vmatmul.mubr.msk.bf16.vlgmr.msra.gmra.mrb[0].mxu1 %vm855_vm11, %v2381_v23  ;;  %v1795_v23 = vld [vmem:[%s2836_s1 + $0x80] sm:$0xff]  ;;  %v2467_v3 = vpop.permute.xlu1 %1026 }
 0x22f   :  { %1730 = vmatprep.mubr.bf16.mxu1 %v1840_v2  ;;  %v1785_v2 = vld [vmem:[%s2836_s1 + $0x20] sm:$0xff]  ;;  %v1034_v16 = vmul.f32 %v2503_v6, %v2467_v3 }
 0x231   :  { %v1037_v40 = vpack.c.bf16 %v1034_v16, %v1034_v16 }
 0x232   :  { %v2469_v35 = vpop.permute.xlu1 %1364  ;;  %v2487_v24 = vpop.permute.xlu0 %963 }
 0x233   :  { %v1372_v44 = vmul.f32 %v2503_v6, %v2469_v35  ;;  %v1043_v49 = vrot.slane %v1037_v40, 4 }
 0x235   :  { %v1375_v21 = vpack.c.bf16 %v1372_v44, %v1372_v44 }
 0x236   :  { %v2471_v36 = vpop.permute.xlu1 %990  ;;  %v2491_v61 = vpop.permute.xlu0 %1028 }
 0x237   :  { %v1381_v39 = vrot.slane %v1375_v21, 4 }
 0x23a   :  { %v2473_v62 = vpop.permute.xlu1 %1328  ;;  %v2493_v46 = vpop.permute.xlu0 %1366 }
 0x23e   :  { %v2475_v41 = vpop.permute.xlu1 %1101  ;;  %v2495_v0 = vpop.permute.xlu0 %992 }
 0x23f   :  { %v1109_v27 = vmul.f32 %v2503_v6, %v2475_v41 }
 0x241   :  { %v1112_v57 = vpack.c.bf16 %v1109_v27, %v1109_v27 }
 0x242   :  { %v2477_v13 = vpop.permute.xlu1 %1439  ;;  %v2497_v53 = vpop.permute.xlu0 %1330 }
 0x243   :  { %v1447_v58 = vmul.f32 %v2503_v6, %v2477_v13  ;;  %v1118_v4 = vrot.slane %v1112_v57, 4 }
 0x245   :  { %v1450_v47 = vpack.c.bf16 %v1447_v58, %v1447_v58 }
 0x246   :  { %v2507_v52 = vpop.permute.xlu0 %1103 }
 0x24a   :  { %v2512_v55 = vpop.permute.xlu0 %1441 }
 0x255   :  { %v2517_v45 = vpop.permute.xlu0 %1067 }
 0x2d2   :  { %v893_v56 = vpop.f32.mrb[0].mxu0 }
 0x2d3   :  { %v941_v5 = vsel %vm59_vm0, %v893_v56, 0.0  ;;  %v895_v51 = vpop.f32.mrb[1].mxu0 }
 0x2d4   :  { %v942_v8 = vsel %vm59_vm0, %v895_v51, 0.0  ;;  %v897_v7 = vpop.f32.mrb[2].mxu0 }
 0x2d5   :  { %v943_v14 = vadd.f32 %v942_v8, %v941_v5  ;;  %v898_v9 = vpop.f32.mrb[3].mxu0 }
 0x2d7   :  { %944 = vadd.xlane.f32.xlu1 %v943_v14 }
 0x2e8   :  { %1065 = vrot.lane.b32.xlu1 %v1785_v2, %s1844_s11 }
 0x2ec   :  { %1403 = vrot.lane.b32.xlu1 %v1785_v2, %s1844_s11 }
 0x2f0   :  { %1146 = vrot.lane.b32.xlu1 %v1789_v59, %s1845_s0 }
 0x2f4   :  { %1484 = vrot.lane.b32.xlu1 %v1789_v59, %s1845_s0 }
 0x2f8   :  { %1221 = vrot.lane.b32.xlu1 %v1793_v17, %s1846_s19 }
 0x2fc   :  { %1559 = vrot.lane.b32.xlu1 %v1793_v17, %s1846_s19 }
 0x300   :  { %1185 = vrot.lane.b32.xlu1 %v1791_v26, %s1847_s26 }
 0x301   :  { %v2436_v54 = vpop.f32.mrb[0].mxu1 }
 0x302   :  { %v1289_v19 = vsel %vm59_vm0, %v2436_v54, 0.0  ;;  %v2440_v22 = vpop.f32.mrb[1].mxu1 }
 0x303   :  { %v1290_v43 = vsel %vm59_vm0, %v2440_v22, 0.0  ;;  %v938_v18 = vpop.f32.mrb[2].mxu1 }
 0x304   :  { %1523 = vrot.lane.b32.xlu1 %v1791_v26, %s1847_s26  ;;  %v939_v29 = vpop.f32.mrb[3].mxu1  ;;  %v1291_v20 = vadd.f32 %v1290_v43, %v1289_v19 }
 0x305   :  { %v998_v29 = vmul.f32 %v2503_v6, %v2471_v36 }
 0x306   :  { %1292 = vadd.xlane.f32.xlu0 %v1291_v20 }
 0x308   :  { %1260 = vrot.lane.b32.xlu1 %v1795_v23, %s1848_s10 }
 0x30c   :  { %1598 = vrot.lane.b32.xlu1 %v1795_v23, %s1848_s10 }
 0x31c   :  { %1405 = vrot.lane.b32.xlu0 %v1786_v38, %s1844_s11 }
 0x320   :  { %1148 = vrot.lane.b32.xlu0 %v1790_v42, %s1845_s0 }
 0x324   :  { %1486 = vrot.lane.b32.xlu0 %v1790_v42, %s1845_s0  ;;  %v1001_v42 = vpack.c.bf16 %v998_v29, %v998_v29 }
 0x328   :  { %1223 = vrot.lane.b32.xlu0 %v1794_v25, %s1846_s19 }
 0x32c   :  { %1561 = vrot.lane.b32.xlu0 %v1794_v25, %s1846_s19  ;;  %v1336_v25 = vmul.f32 %v2503_v6, %v2473_v62 }
 0x330   :  { %1187 = vrot.lane.b32.xlu0 %v1792_v63, %s1847_s26 }
 0x364   :  { %v945_v11 = vpop.xlane.xlu1 %944 }
 0x365   :  { %v946_v12 = vmul.f32 0.00390625, %v945_v11 }
 0x367   :  { %v2479_v32 = vsub.f32 %v893_v56, %v946_v12  ;;  %v2481_v28 = vsub.f32 %v895_v51, %v946_v12  ;;  %v1456_v51 = vrot.slane %v1450_v47, 4 }
 0x368   :  { %v1066_v12 = vpop.permute.xlu1 %1065 }
 0x369   :  { %v949_v50 = vmul.f32 %v2479_v32, %v2479_v32  ;;  %v950_v10 = vmul.f32 %v2481_v28, %v2481_v28 }
 0x36b   :  { %v951_v60 = vsel %vm59_vm0, %v949_v50, 0.0  ;;  %v952_v48 = vsel %vm59_vm0, %v950_v10, 0.0  ;;  %v1073_v50 = vmul.f32 %v2503_v6, %v1066_v12 }
 0x36c   :  { %v953_v37 = vadd.f32 %v952_v48, %v951_v60  ;;  %v1339_v60 = vpack.c.bf16 %v1336_v25, %v1336_v25  ;;  %v994_v25 = vsel %vm143_vm2, %v2471_v36, %v2495_v0 }
 0x36e   :  { %954 = vadd.xlane.f32.xlu0 %v953_v37  ;;  %v2566_v37 = vpop.permute.xlu1 %1403 }
 0x36f   :  { %v1411_v16 = vmul.f32 %v2503_v6, %v2566_v37 }
 0x371   :  { %v1414_v40 = vpack.c.bf16 %v1411_v16, %v1411_v16 }
 0x384   :  { %1525 = vrot.lane.b32.xlu0 %v1792_v63, %s1847_s26 }
 0x388   :  { %1262 = vrot.lane.b32.xlu0 %v1796_v30, %s1848_s10 }
 0x38c   :  { %1600 = vrot.lane.b32.xlu0 %v1796_v30, %s1848_s10  ;;  %v1076_v30 = vpack.c.bf16 %v1073_v50, %v1073_v50 }
 0x390   :  { %1046 = vrot.lane.b32.xlu0 %v1043_v49, %s1846_s19 }
 0x393   :  { %v1293_v34 = vpop.xlane.xlu0 %1292 }
 0x394   :  { %1384 = vrot.lane.b32.xlu0 %v1381_v39, %s1846_s19  ;;  %v1294_v1 = vmul.f32 0.00390625, %v1293_v34  ;;  %v2576_v39 = vpop.permute.xlu1 %1146 }
 0x396   :  { %v2524_v15 = vsub.f32 %v2436_v54, %v1294_v1  ;;  %v2527_v31 = vsub.f32 %v2440_v22, %v1294_v1 }
 0x397   :  { %v2530_v38 = vpop.permute.xlu0 %1405 }
 0x398   :  { %1121 = vrot.lane.b32.xlu0 %v1118_v4, %s1845_s0  ;;  %v1297_v56 = vmul.f32 %v2524_v15, %v2524_v15  ;;  %v1298_v5 = vmul.f32 %v2527_v31, %v2527_v31 }
 0x39a   :  { %v1299_v8 = vsel %vm59_vm0, %v1297_v56, 0.0  ;;  %v1300_v7 = vsel %vm59_vm0, %v1298_v5, 0.0  ;;  %v2584_v56 = vpop.permute.xlu1 %1484 }
 0x39b   :  { %v1301_v14 = vadd.f32 %v1300_v7, %v1299_v8  ;;  %v2539_v9 = vpop.permute.xlu0 %1148 }
 0x39c   :  { %1459 = vrot.lane.b32.xlu0 %v1456_v51, %s1845_s0  ;;  %v1156_v2 = vmul.f32 %v2503_v6, %v2539_v9 }
 0x39d   :  { %1302 = vadd.xlane.f32.xlu1 %v1301_v14 }
 0x39e   :  { %v1159_v59 = vpack.c.bf16 %v1156_v2, %v1156_v2  ;;  %v2587_v7 = vpop.permute.xlu1 %1221 }
 0x39f   :  { %v2543_v17 = vpop.permute.xlu0 %1486 }
 0x3a0   :  { %v1165_v26 = vrot.slane %v1159_v59, 4  ;;  %v1494_v54 = vmul.f32 %v2503_v6, %v2543_v17 }
 0x3a2   :  { %v1497_v19 = vpack.c.bf16 %v1494_v54, %v1494_v54  ;;  %1170 = vrot.lane.b32.xlu0 %v1165_v26, %s1843_s25 }
 0x3a3   :  { %v2548_v22 = vpop.permute.xlu0 %1223 }
 0x3a4   :  { %v1503_v43 = vrot.slane %v1497_v19, 4  ;;  %v1231_v20 = vmul.f32 %v2503_v6, %v2548_v22 }
 0x3a6   :  { %1508 = vrot.lane.b32.xlu0 %v1503_v43, %s1843_s25  ;;  %v1234_v63 = vpack.c.bf16 %v1231_v20, %v1231_v20  ;;  %v2596_v43 = vpop.permute.xlu1 %1559 }
 0x3a7   :  { %v2551_v18 = vpop.permute.xlu0 %1561 }
 0x3a8   :  { %v1240_v48 = vrot.slane %v1234_v63, 4  ;;  %v1569_v21 = vmul.f32 %v2503_v6, %v2551_v18 }
 0x3aa   :  { %v1572_v34 = vpack.c.bf16 %v1569_v21, %v1569_v21 }
 0x3ab   :  { %v2557_v23 = vpop.permute.xlu0 %1187 }
 0x3ac   :  { %v1195_v11 = vmul.f32 %v2503_v6, %v2557_v23  ;;  %v1578_v5 = vrot.slane %v1572_v34, 4 }
 0x3ae   :  { %1007 = vrot.lane.b32.xlu1 %v1001_v42, %s1848_s10  ;;  %v1198_v10 = vpack.c.bf16 %v1195_v11, %v1195_v11 }
 0x3b0   :  { %1206 = vrot.lane.b32.xlu0 %v1198_v10, %s1844_s11 }
 0x3b2   :  { %1345 = vrot.lane.b32.xlu1 %v1339_v60, %s1848_s10 }
 0x3b4   :  { %1245 = vrot.lane.b32.xlu0 %v1240_v48, %s1841_s15  ;;  %v1069_v48 = vsel %vm224_vm4, %v1066_v12, %v2517_v45 }
 0x3b6   :  { %1082 = vrot.lane.b32.xlu1 %v1076_v30, %s1847_s26 }
 0x3ba   :  { %1420 = vrot.lane.b32.xlu1 %v1414_v40, %s1847_s26 }
 0x3fb   :  { %v955_v44 = vpop.xlane.xlu0 %954 }
 0x3fc   :  { %v956_v49 = vmul.f32 0.00390625, %v955_v44 }
 0x3fe   :  { %v957_v27 = vadd.f32 1e-05, %v956_v49 }
 0x3ff   :  { %v2578_v57 = vpop.permute.xlu0 %1525 }
 0x400   :  { %1834 = vrsqrt.f32 %v957_v27  ;;  %v1533_v58 = vmul.f32 %v2503_v6, %v2578_v57 }
 0x402   :  { %v1536_v1 = vpack.c.bf16 %v1533_v58, %v1533_v58 }
 0x403   :  { %v1263_v4 = vpop.permute.xlu0 %1262 }
 0x404   :  { %v1270_v47 = vmul.f32 %v2503_v6, %v1263_v4  ;;  %1544 = vrot.lane.b32.xlu0 %v1536_v1, %s1844_s11 }
 0x406   :  { %v1273_v51 = vpack.c.bf16 %v1270_v47, %v1270_v47 }
 0x408   :  { %1583 = vrot.lane.b32.xlu0 %v1578_v5, %s1841_s15 }
 0x40a   :  { %v1835_v8 = vpop.eup %1834 }
 0x40b   :  { %v959_v14 = vmul.f32 %v1835_v8, %v2479_v32  ;;  %v960_v2 = vmul.f32 %v1835_v8, %v2481_v28  ;;  %v1186_v28 = vpop.permute.xlu1 %1185 }
 0x40c   :  { %1281 = vrot.lane.b32.xlu0 %v1273_v51, %s1842_s20  ;;  %v1189_v49 = vsel %vm244_vm6, %v1186_v28, %v2557_v23 }
 0x40d   :  { %v966_v59 = vmul.f32 %v2487_v24, %v959_v14  ;;  %v967_v26 = vmul.f32 %v2487_v24, %v960_v2 }
 0x40f   :  { %v973_v54 = vadd.f32 %v2465_v33, %v966_v59  ;;  %v974_v19 = vadd.f32 %v2465_v33, %v967_v26  ;;  %v2601_v63 = vpop.permute.xlu1 %1523  ;;  %v1030_v59 = vsel %vm182_vm3, %v2467_v3, %v2491_v61 }
 0x411   :  { %vm975_vm12 = vcmp.gt.f32.partialorder %v973_v54, 0.0  ;;  %vm976_vm13 = vcmp.gt.f32.partialorder %v974_v19, 0.0  ;;  %v977_v29 = vmul.f32 0.01, %v973_v54  ;;  %v978_v20 = vmul.f32 0.01, %v974_v19 }
 0x413   :  { %v979_v42 = vsel %vm975_vm12, %v973_v54, %v977_v29  ;;  %v980_v32 = vsel %vm976_vm13, %v974_v19, %v978_v20 }
 0x414   :  { %981 = vst [vmem:[#allocation2 + $0x8] sm:$0xf] %v979_v42  ;;  %982 = vst [vmem:[#allocation2 + $0x10] sm:$0xf] %v980_v32 }
 0x41b   :  { %v2603_v11 = vld [vmem:[#allocation2 + $0x8] sm:$0xff]  ;;  %v2605_v50 = vld [vmem:[#allocation2 + $0x10] sm:$0xff] }
 0x41c   :  { %v1000_v10 = vmul.f32 %v2605_v50, %v2495_v0  ;;  %v999_v60 = vmul.f32 %v2603_v11, %v994_v25  ;;  %v1075_v30 = vmul.f32 %v2605_v50, %v2517_v45  ;;  %v1074_v36 = vmul.f32 %v2603_v11, %v1069_v48  ;;  %v2621_v0 = vpop.permute.xlu1 %1260 }
 0x41d   :  { %v1036_v44 = vmul.f32 %v2605_v50, %v2491_v61  ;;  %v1194_v12 = vmul.f32 %v1189_v49, %v2605_v50  ;;  %v1111_v45 = vmul.f32 %v2605_v50, %v2507_v52  ;;  %v1136_v23 = vpack.c.bf16 %v2605_v50, %v2605_v50 }
 0x41e   :  { %v1003_v16 = vpack.c.bf16 %v1000_v10, %v1000_v10  ;;  %v1002_v40 = vpack.c.bf16 %v999_v60, %v999_v60  ;;  %v1078_v21 = vpack.c.bf16 %v1075_v30, %v1075_v30  ;;  %v1077_v27 = vpack.c.bf16 %v1074_v36, %v1074_v36 }
 0x41f   :  { %v1039_v58 = vpack.c.bf16 %v1036_v44, %v1036_v44  ;;  %v1197_v34 = vpack.c.bf16 %v1194_v12, %v1194_v12  ;;  %v1114_v1 = vpack.c.bf16 %v1111_v45, %v1111_v45  ;;  %v1193_v5 = vmul.f32 %v1186_v28, %v2603_v11  ;;  %1138 = vst [vmem:[#allocation3 + $0x48] sm:$0xf] %v1136_v23 }
 0x420   :  { %1011 = vrot.lane.b32.xlu0 %v1003_v16, %s1848_s10  ;;  %1009 = vrot.lane.b32.xlu1 %v1002_v40, %s1848_s10  ;;  %v1229_v51 = vmul.f32 %v2587_v7, %v2603_v11  ;;  %v1135_v8 = vpack.c.bf16 %v2603_v11, %v2603_v11  ;;  %v2635_v14 = vpop.permute.xlu1 %1598  ;;  %v1264_v2 = vsel %vm163_vm8, %v2621_v0, %v1263_v4 }
 0x421   :  { %v1045_v47 = vrot.slane %v1039_v58, 4  ;;  %v1269_v26 = vmul.f32 %v1264_v2, %v2605_v50  ;;  %v1120_v54 = vrot.slane %v1114_v1, 4  ;;  %v1196_v19 = vpack.c.bf16 %v1193_v5, %v1193_v5 }
 0x422   :  { %1137 = vst [vmem:[#allocation3 + $0x40] sm:$0xf] %v1135_v8  ;;  %v1232_v29 = vpack.c.bf16 %v1229_v51, %v1229_v51  ;;  %v1035_v20 = vmul.f32 %v2603_v11, %v1030_v59  ;;  %v1105_v4 = vsel %vm263_vm5, %v2475_v41, %v2507_v52  ;;  %v1150_v60 = vsel %vm286_vm7, %v2576_v39, %v2539_v9 }
 0x423   :  { %v1272_v28 = vpack.c.bf16 %v1269_v26, %v1269_v26  ;;  %v1110_v10 = vmul.f32 %v2603_v11, %v1105_v4  ;;  %v1155_v16 = vmul.f32 %v1150_v60, %v2605_v50  ;;  %v1154_v40 = vmul.f32 %v2576_v39, %v2603_v11 }
 0x424   :  { %1086 = vrot.lane.b32.xlu0 %v1078_v21, %s1847_s26  ;;  %1084 = vrot.lane.b32.xlu1 %v1077_v27, %s1847_s26  ;;  %v1238_v3 = vrot.slane %v1232_v29, 4  ;;  %v1038_v61 = vpack.c.bf16 %v1035_v20, %v1035_v20  ;;  %v1225_v36 = vsel %vm205_vm9, %v2587_v7, %v2548_v22  ;;  %v1407_v8 = vsel %vm224_vm4, %v2566_v37, %v2530_v38 }
 0x425   :  { %v1113_v30 = vpack.c.bf16 %v1110_v10, %v1110_v10  ;;  %v1158_v52 = vpack.c.bf16 %v1155_v16, %v1155_v16  ;;  %v1157_v9 = vpack.c.bf16 %v1154_v40, %v1154_v40  ;;  %v1230_v12 = vmul.f32 %v1225_v36, %v2605_v50 }
 0x426   :  { %v1044_v48 = vrot.slane %v1038_v61, 4  ;;  %v1488_v36 = vsel %vm286_vm7, %v2584_v56, %v2543_v17 }
 0x427   :  { %v1119_v41 = vrot.slane %v1113_v30, 4  ;;  %v1164_v49 = vrot.slane %v1158_v52, 4  ;;  %v1163_v58 = vrot.slane %v1157_v9, 4  ;;  %v1233_v23 = vpack.c.bf16 %v1230_v12, %v1230_v12 }
 0x428   :  { %1050 = vrot.lane.b32.xlu0 %v1045_v47, %s1846_s19  ;;  %1204 = vrot.lane.b32.xlu1 %v1197_v34, %s1844_s11 }
 0x429   :  { %v1239_v50 = vrot.slane %v1233_v23, 4 }
 0x42a   :  { %v1303_v42 = vpop.xlane.xlu1 %1302 }
 0x42b   :  { %v1304_v32 = vmul.f32 0.00390625, %v1303_v42 }
 0x42c   :  { %1125 = vrot.lane.b32.xlu0 %v1120_v54, %s1845_s0  ;;  %1202 = vrot.lane.b32.xlu1 %v1196_v19, %s1844_s11  ;;  %v1601_v19 = vpop.permute.xlu0 %1600 }
 0x42d   :  { %v1305_v25 = vadd.f32 1e-05, %v1304_v32  ;;  %v1368_v32 = vsel %vm182_vm3, %v2469_v35, %v2493_v46  ;;  %v1608_v52 = vmul.f32 %v2503_v6, %v1601_v19  ;;  %v1563_v6 = vsel %vm205_vm9, %v2596_v43, %v2551_v18 }
 0x42e   :  { %v1602_v18 = vsel %vm163_vm8, %v2635_v14, %v1601_v19 }
 0x42f   :  { %1836 = vrsqrt.f32 %v1305_v25  ;;  %v1611_v12 = vpack.c.bf16 %v1608_v52, %v1608_v52 }
 0x430   :  { %1241 = vrot.lane.b32.xlu0 %v1238_v3, %s1841_s15  ;;  %1279 = vrot.lane.b32.xlu1 %v1272_v28, %s1842_s20  ;;  %v2710_v3 = vpop.permute.xlu0 %1046 }
 0x434   :  { %1048 = vrot.lane.b32.xlu1 %v1044_v48, %s1846_s19  ;;  %v2724_v40 = vpop.permute.xlu0 %1384 }
 0x438   :  { %1123 = vrot.lane.b32.xlu1 %v1119_v41, %s1845_s0 }
 0x439   :  { %v1837_v44 = vpop.eup %1836 }
 0x43a   :  { %v1307_v45 = vmul.f32 %v1837_v44, %v2524_v15  ;;  %v1308_v21 = vmul.f32 %v1837_v44, %v2527_v31 }
 0x43c   :  { %1168 = vrot.lane.b32.xlu1 %v1164_v49, %s1843_s25  ;;  %v1309_v27 = vmul.f32 %v1307_v45, %v2487_v24  ;;  %v1310_v39 = vmul.f32 %v1308_v21, %v2487_v24  ;;  %v1332_v24 = vsel %vm143_vm2, %v2473_v62, %v2497_v53  ;;  %v2739_v45 = vpop.permute.xlu0 %1121 }
 0x43e   :  { %v1311_v34 = vadd.f32 %v1309_v27, %v2465_v33  ;;  %v1312_v22 = vadd.f32 %v1310_v39, %v2465_v33 }
 0x440   :  { %1166 = vrot.lane.b32.xlu1 %v1163_v58, %s1843_s25  ;;  %vm1313_vm14 = vcmp.gt.f32.partialorder %v1311_v34, 0.0  ;;  %vm1314_vm15 = vcmp.gt.f32.partialorder %v1312_v22, 0.0  ;;  %v1315_v7 = vmul.f32 0.01, %v1311_v34  ;;  %v1316_v15 = vmul.f32 0.01, %v1312_v22 }
 0x442   :  { %v1317_v31 = vsel %vm1313_vm14, %v1311_v34, %v1315_v7  ;;  %v1318_v1 = vsel %vm1314_vm15, %v1312_v22, %v1316_v15  ;;  %v2746_v22 = vpop.permute.xlu0 %1459 }
 0x443   :  { %1319 = vst [vmem:[#allocation2 + $0x8] sm:$0xf] %v1317_v31  ;;  %1320 = vst [vmem:[#allocation2 + $0x10] sm:$0xf] %v1318_v1  ;;  %v1268_v1 = vmul.f32 %v2621_v0, %v2603_v11 }
 0x444   :  { %1243 = vrot.lane.b32.xlu1 %v1239_v50, %s1841_s15 }
 0x446   :  { %v1171_v50 = vpop.permute.xlu0 %1170 }
 0x44a   :  { %v2678_v47 = vld [vmem:[#allocation2 + $0x10] sm:$0xff]  ;;  %v2680_v33 = vld [vmem:[#allocation2 + $0x8] sm:$0xff] }
 0x44b   :  { %v1338_v5 = vmul.f32 %v2497_v53, %v2678_v47  ;;  %v1337_v51 = vmul.f32 %v1332_v24, %v2680_v33  ;;  %v1413_v2 = vmul.f32 %v2530_v38, %v2678_v47  ;;  %v1412_v62 = vmul.f32 %v1407_v8, %v2680_v33  ;;  %v2758_v24 = vpop.permute.xlu0 %1508 }
 0x44c   :  { %v1374_v54 = vmul.f32 %v2493_v46, %v2678_v47  ;;  %v1527_v53 = vsel %vm244_vm6, %v2601_v63, %v2578_v57  ;;  %v1449_v38 = vmul.f32 %v2512_v55, %v2678_v47  ;;  %v1531_v28 = vmul.f32 %v2601_v63, %v2680_v33 }
 0x44d   :  { %v1341_v59 = vpack.c.bf16 %v1338_v5, %v1338_v5  ;;  %v1340_v26 = vpack.c.bf16 %v1337_v51, %v1337_v51  ;;  %v1532_v37 = vmul.f32 %v1527_v53, %v2678_v47  ;;  %v1416_v29 = vpack.c.bf16 %v1413_v2, %v1413_v2  ;;  %v1008_v5 = vpop.permute.xlu1 %1007 }
 0x44e   :  { %v1415_v20 = vpack.c.bf16 %v1412_v62, %v1412_v62  ;;  %v1377_v42 = vpack.c.bf16 %v1374_v54, %v1374_v54  ;;  %v1452_v4 = vpack.c.bf16 %v1449_v38, %v1449_v38  ;;  %v1492_v25 = vmul.f32 %v2584_v56, %v2680_v33 }
 0x44f   :  { %1349 = vrot.lane.b32.xlu0 %v1341_v59, %s1848_s10  ;;  %1347 = vrot.lane.b32.xlu1 %v1340_v26, %s1848_s10  ;;  %v1535_v57 = vpack.c.bf16 %v1532_v37, %v1532_v37  ;;  %v1373_v10 = vmul.f32 %v1368_v32, %v2680_v33  ;;  %v1474_v35 = vpack.c.bf16 %v2678_v47, %v2678_v47 }
 0x450   :  { %v1383_v61 = vrot.slane %v1377_v42, 4  ;;  %v1473_v46 = vpack.c.bf16 %v2680_v33, %v2680_v33  ;;  %v1443_v63 = vsel %vm263_vm5, %v2477_v13, %v2512_v55  ;;  %v1534_v60 = vpack.c.bf16 %v1531_v28, %v1531_v28 }
 0x451   :  { %1476 = vst [vmem:[#allocation3 + $0x58] sm:$0xf] %v1474_v35  ;;  %v1458_v48 = vrot.slane %v1452_v4, 4  ;;  %v1495_v30 = vpack.c.bf16 %v1492_v25, %v1492_v25  ;;  %v1376_v16 = vpack.c.bf16 %v1373_v10, %v1373_v10  ;;  %v1448_v41 = vmul.f32 %v1443_v63, %v2680_v33  ;;  %v2766_v2 = vpop.permute.xlu1 %1345 }
 0x452   :  { %1475 = vst [vmem:[#allocation3 + $0x50] sm:$0xf] %v1473_v46  ;;  %v1567_v13 = vmul.f32 %v2596_v43, %v2680_v33  ;;  %v1493_v9 = vmul.f32 %v1488_v36, %v2678_v47  ;;  %v1568_v27 = vmul.f32 %v1563_v6, %v2678_v47  ;;  %v1606_v23 = vmul.f32 %v2635_v14, %v2680_v33  ;;  %v1648_v14 = vld [vmem:[%s2841_s8] sm:$0xff] }
 0x453   :  { %1424 = vrot.lane.b32.xlu0 %v1416_v29, %s1847_s26  ;;  %1422 = vrot.lane.b32.xlu1 %v1415_v20, %s1847_s26  ;;  %v1501_v55 = vrot.slane %v1495_v30, 4  ;;  %v1382_v44 = vrot.slane %v1376_v16, 4  ;;  %v1451_v49 = vpack.c.bf16 %v1448_v41, %v1448_v41  ;;  %v1607_v15 = vmul.f32 %v1602_v18, %v2678_v47  ;;  %v1207_v47 = vpop.permute.xlu0 %1206 }
 0x454   :  { %v1570_v56 = vpack.c.bf16 %v1567_v13, %v1567_v13  ;;  %v1496_v21 = vpack.c.bf16 %v1493_v9, %v1493_v9  ;;  %v1571_v34 = vpack.c.bf16 %v1568_v27, %v1568_v27  ;;  %v1609_v43 = vpack.c.bf16 %v1606_v23, %v1606_v23 }
 0x455   :  { %v1457_v17 = vrot.slane %v1451_v49, 4  ;;  %v1610_v31 = vpack.c.bf16 %v1607_v15, %v1607_v15  ;;  %v1271_v33 = vpack.c.bf16 %v1268_v1, %v1268_v1  ;;  %v1083_v11 = vpop.permute.xlu1 %1082 }
 0x456   :  { %v1576_v39 = vrot.slane %v1570_v56, 4  ;;  %v1502_v58 = vrot.slane %v1496_v21, 4  ;;  %v1577_v7 = vrot.slane %v1571_v34, 4 }
 0x457   :  { %1388 = vrot.lane.b32.xlu0 %v1383_v61, %s1846_s19  ;;  %1542 = vrot.lane.b32.xlu1 %v1535_v57, %s1844_s11  ;;  %v1246_v51 = vpop.permute.xlu0 %1245 }
 0x459   :  { %v2770_v26 = vpop.permute.xlu1 %1420 }
 0x45b   :  { %1463 = vrot.lane.b32.xlu0 %v1458_v48, %s1845_s0  ;;  %1540 = vrot.lane.b32.xlu1 %v1534_v60, %s1844_s11 }
 0x45f   :  { %1504 = vrot.lane.b32.xlu0 %v1501_v55, %s1843_s25  ;;  %1386 = vrot.lane.b32.xlu1 %v1382_v44, %s1846_s19 }
 0x463   :  { %1619 = vrot.lane.b32.xlu0 %v1611_v12, %s1842_s20  ;;  %1461 = vrot.lane.b32.xlu1 %v1457_v17, %s1845_s0 }
 0x467   :  { %1579 = vrot.lane.b32.xlu0 %v1576_v39, %s1841_s15  ;;  %1506 = vrot.lane.b32.xlu1 %v1502_v58, %s1843_s25 }
 0x46b   :  { %1615 = vrot.lane.b32.xlu0 %v1609_v43, %s1842_s20  ;;  %1581 = vrot.lane.b32.xlu1 %v1577_v7, %s1841_s15 }
 0x46f   :  { %1617 = vrot.lane.b32.xlu1 %v1610_v31, %s1842_s20 }
 0x473   :  { %1277 = vrot.lane.b32.xlu1 %v1271_v33, %s1842_s20 }
 0x476   :  { %v2764_v8 = vpop.permute.xlu0 %1544 }
 0x477   :  { %1651 = vperm.xlu1 %1827, %v1648_v14  }
 0x47a   :  { %v2768_v0 = vpop.permute.xlu0 %1583 }
 0x47e   :  { %v1282_v59 = vpop.permute.xlu0 %1281 }
 0x492   :  { %v1012_v62 = vpop.permute.xlu0 %1011  ;;  %v1010_v54 = vpop.permute.xlu1 %1009 }
 0x493   :  { %v1013_v53 = vsel %vm163_vm8, %v1008_v5, %v1010_v54  ;;  %v1014_v19 = vsel %vm163_vm8, %v1010_v54, %v1012_v62 }
 0x494   :  { %1017 = vst [vmem:[#allocation3] sm:$0xf] %v1013_v53  ;;  %1018 = vst [vmem:[#allocation3 + $0x8] sm:$0xf] %v1014_v19 }
 0x496   :  { %v1087_v37 = vpop.permute.xlu0 %1086  ;;  %v1085_v38 = vpop.permute.xlu1 %1084 }
 0x497   :  { %v1088_v29 = vsel %vm244_vm6, %v1083_v11, %v1085_v38  ;;  %v1089_v20 = vsel %vm244_vm6, %v1085_v38, %v1087_v37 }
 0x498   :  { %1092 = vst [vmem:[#allocation3 + $0x20] sm:$0xf] %v1088_v29  ;;  %1093 = vst [vmem:[#allocation3 + $0x28] sm:$0xf] %v1089_v20 }
 0x49a   :  { %v1205_v42 = vpop.permute.xlu1 %1204  ;;  %v1051_v61 = vpop.permute.xlu0 %1050 }
 0x49b   :  { %v1209_v32 = vsel %vm224_vm4, %v1205_v42, %v1207_v47 }
 0x49c   :  { %1213 = vst [vmem:[#allocation3 + $0x68] sm:$0xf] %v1209_v32 }
 0x49e   :  { %v1203_v57 = vpop.permute.xlu1 %1202  ;;  %v1126_v63 = vpop.permute.xlu0 %1125 }
 0x49f   :  { %v1208_v4 = vsel %vm224_vm4, %v1203_v57, %v1205_v42 }
 0x4a0   :  { %1212 = vst [vmem:[#allocation3 + $0x60] sm:$0xf] %v1208_v4 }
 0x4a2   :  { %v2778_v28 = vpop.permute.xlu1 %1279  ;;  %v1242_v49 = vpop.permute.xlu0 %1241 }
 0x4a3   :  { %v1284_v25 = vsel %vm143_vm2, %v2778_v28, %v1282_v59 }
 0x4a4   :  { %1288 = vst [vmem:[#allocation3 + $0x88] sm:$0xf] %v1284_v25 }
 0x4a6   :  { %v1049_v10 = vpop.permute.xlu1 %1048 }
 0x4a7   :  { %v1052_v35 = vsel %vm205_vm9, %v2710_v3, %v1049_v10  ;;  %v1053_v46 = vsel %vm205_vm9, %v1049_v10, %v1051_v61 }
 0x4a8   :  { %1056 = vst [vmem:[#allocation3] sm:$0xf0] %v1052_v35  ;;  %1057 = vst [vmem:[#allocation3 + $0x8] sm:$0xf0] %v1053_v46 }
 0x4aa   :  { %v1124_v60 = vpop.permute.xlu1 %1123 }
 0x4ab   :  { %v1127_v48 = vsel %vm286_vm7, %v2739_v45, %v1124_v60  ;;  %v1128_v30 = vsel %vm286_vm7, %v1124_v60, %v1126_v63  ;;  %v1645_v27 = vld [vmem:[#allocation3 + $0x88] sm:$0xff] }
 0x4ac   :  { %1131 = vst [vmem:[#allocation3 + $0x20] sm:$0xf0] %v1127_v48  ;;  %1132 = vst [vmem:[#allocation3 + $0x28] sm:$0xf0] %v1128_v30  ;;  %v1627_v30 = vld [vmem:[%s2842_s3] sm:$0xf] }
 0x4ae   :  { %v1169_v16 = vpop.permute.xlu1 %1168 }
 0x4af   :  { %v1173_v41 = vsel %vm263_vm5, %v1169_v16, %v1171_v50  ;;  %v1629_v52 = vld [vmem:[#allocation3 + $0x8] sm:$0xff]  ;;  %v1628_v36 = vld [vmem:[#allocation3] sm:$0xff] }
 0x4b0   :  { %1177 = vst [vmem:[#allocation3 + $0x48] sm:$0xf0] %v1173_v41  ;;  %1657 = vmatprep.subr.bf16.mxu0 %v1629_v52 }
 0x4b1   :  { %1658 = vmatpush1.bf16.msra.mxu0 %v1628_v36 }
 0x4b2   :  { %v1167_v3 = vpop.permute.xlu1 %1166 }
 0x4b3   :  { %v1172_v13 = vsel %vm263_vm5, %v1167_v3, %v1169_v16  ;;  %v1633_v55 = vld [vmem:[#allocation3 + $0x28] sm:$0xff]  ;;  %v1632_v44 = vld [vmem:[#allocation3 + $0x20] sm:$0xff] }
 0x4b4   :  { %1176 = vst [vmem:[#allocation3 + $0x40] sm:$0xf0] %v1172_v13  ;;  %1659 = vmatprep.subr.bf16.mxu0 %v1633_v55 }
 0x4b5   :  { %1660 = vmatpush1.bf16.msra.mxu0 %v1632_v44 }
 0x4b6   :  { %v1244_v9 = vpop.permute.xlu1 %1243 }
 0x4b7   :  { %v1247_v12 = vsel %vm182_vm3, %v1242_v49, %v1244_v9  ;;  %v1248_v6 = vsel %vm182_vm3, %v1244_v9, %v1246_v51  ;;  %v1637_v45 = vld [vmem:[#allocation3 + $0x48] sm:$0xff] }
 0x4b8   :  { %1251 = vst [vmem:[#allocation3 + $0x60] sm:$0xf0] %v1247_v12  ;;  %1252 = vst [vmem:[#allocation3 + $0x68] sm:$0xf0] %v1248_v6  ;;  %1661 = vmatprep.subr.bf16.mxu0 %v1637_v45 }
 0x4bb   :  { %v1636_v17 = vld [vmem:[#allocation3 + $0x40] sm:$0xff] }
 0x4bc   :  { %1662 = vmatpush1.bf16.msra.mxu0 %v1636_v17 }
 0x4bf   :  { %v1641_v56 = vld [vmem:[#allocation3 + $0x68] sm:$0xff]  ;;  %v1640_v21 = vld [vmem:[#allocation3 + $0x60] sm:$0xff] }
 0x4c0   :  { %1663 = vmatprep.subr.bf16.mxu0 %v1641_v56 }
 0x4c1   :  { %1664 = vmatpush1.bf16.msra.mxu0 %v1640_v21  ;;  %v1350_v39 = vpop.permute.xlu0 %1349  ;;  %v1348_v58 = vpop.permute.xlu1 %1347 }
 0x4c2   :  { %1665 = vmatprep.subr.bf16.mxu0 %v1645_v27  ;;  %v1351_v23 = vsel %vm163_vm8, %v2766_v2, %v1348_v58  ;;  %v1352_v34 = vsel %vm163_vm8, %v1348_v58, %v1350_v39 }
 0x4c3   :  { %1355 = vst [vmem:[#allocation3 + $0x10] sm:$0xf] %v1351_v23  ;;  %1356 = vst [vmem:[#allocation3 + $0x18] sm:$0xf] %v1352_v34 }
 0x4c5   :  { %v1425_v18 = vpop.permute.xlu0 %1424  ;;  %v1423_v43 = vpop.permute.xlu1 %1422 }
 0x4c6   :  { %v1426_v7 = vsel %vm244_vm6, %v2770_v26, %v1423_v43  ;;  %v1427_v15 = vsel %vm244_vm6, %v1423_v43, %v1425_v18 }
 0x4c7   :  { %1430 = vst [vmem:[#allocation3 + $0x30] sm:$0xf] %v1426_v7  ;;  %1431 = vst [vmem:[#allocation3 + $0x38] sm:$0xf] %v1427_v15 }
 0x4c9   :  { %v1389_v50 = vpop.permute.xlu0 %1388  ;;  %v1543_v31 = vpop.permute.xlu1 %1542 }
 0x4ca   :  { %v1547_v1 = vsel %vm224_vm4, %v1543_v31, %v2764_v8 }
 0x4cb   :  { %1551 = vst [vmem:[#allocation3 + $0x78] sm:$0xf] %v1547_v1 }
 0x4cd   :  { %v1464_v33 = vpop.permute.xlu0 %1463  ;;  %v1541_v14 = vpop.permute.xlu1 %1540 }
 0x4ce   :  { %v1546_v47 = vsel %vm224_vm4, %v1541_v14, %v1543_v31 }
 0x4cf   :  { %1550 = vst [vmem:[#allocation3 + $0x70] sm:$0xf] %v1546_v47 }
 0x4d1   :  { %v1505_v5 = vpop.permute.xlu0 %1504  ;;  %v1387_v51 = vpop.permute.xlu1 %1386 }
 0x4d2   :  { %v1390_v2 = vsel %vm205_vm9, %v2724_v40, %v1387_v51  ;;  %v1391_v11 = vsel %vm205_vm9, %v1387_v51, %v1389_v50 }
 0x4d3   :  { %1394 = vst [vmem:[#allocation3 + $0x10] sm:$0xf0] %v1390_v2  ;;  %1395 = vst [vmem:[#allocation3 + $0x18] sm:$0xf0] %v1391_v11 }
 0x4d5   :  { %v1620_v59 = vpop.permute.xlu0 %1619  ;;  %v1462_v26 = vpop.permute.xlu1 %1461 }
 0x4d6   :  { %v1465_v8 = vsel %vm286_vm7, %v2746_v22, %v1462_v26  ;;  %v1466_v62 = vsel %vm286_vm7, %v1462_v26, %v1464_v33 }
 0x4d7   :  { %1469 = vst [vmem:[#allocation3 + $0x30] sm:$0xf0] %v1465_v8  ;;  %1470 = vst [vmem:[#allocation3 + $0x38] sm:$0xf0] %v1466_v62 }
 0x4d9   :  { %v1507_v54 = vpop.permute.xlu1 %1506  ;;  %v1580_v38 = vpop.permute.xlu0 %1579 }
 0x4da   :  { %v1510_v53 = vsel %vm263_vm5, %v1505_v5, %v1507_v54  ;;  %v1511_v19 = vsel %vm263_vm5, %v1507_v54, %v2758_v24  ;;  %v1631_v40 = vld [vmem:[#allocation3 + $0x18] sm:$0xff]  ;;  %v1630_v37 = vld [vmem:[#allocation3 + $0x10] sm:$0xff] }
 0x4db   :  { %1514 = vst [vmem:[#allocation3 + $0x50] sm:$0xf0] %v1510_v53  ;;  %1515 = vst [vmem:[#allocation3 + $0x58] sm:$0xf0] %v1511_v19  ;;  %1698 = vmatprep.subr.bf16.mxu1 %v1631_v40 }
 0x4dc   :  { %1699 = vmatpush1.bf16.msra.mxu1 %v1630_v37 }
 0x4dd   :  { %v1582_v29 = vpop.permute.xlu1 %1581  ;;  %v1616_v24 = vpop.permute.xlu0 %1615 }
 0x4de   :  { %v1585_v22 = vsel %vm182_vm3, %v1580_v38, %v1582_v29  ;;  %v1586_v20 = vsel %vm182_vm3, %v1582_v29, %v2768_v0  ;;  %v1635_v42 = vld [vmem:[#allocation3 + $0x38] sm:$0xff]  ;;  %v1634_v32 = vld [vmem:[#allocation3 + $0x30] sm:$0xff] }
 0x4df   :  { %1589 = vst [vmem:[#allocation3 + $0x70] sm:$0xf0] %v1585_v22  ;;  %1590 = vst [vmem:[#allocation3 + $0x78] sm:$0xf0] %v1586_v20  ;;  %1700 = vmatprep.subr.bf16.mxu1 %v1635_v42 }
 0x4e0   :  { %1701 = vmatpush1.bf16.msra.mxu1 %v1634_v32 }
 0x4e1   :  { %v1618_v57 = vpop.permute.xlu1 %1617 }
 0x4e2   :  { %v1621_v4 = vsel %vm143_vm2, %v1616_v24, %v1618_v57  ;;  %v1622_v25 = vsel %vm143_vm2, %v1618_v57, %v1620_v59  ;;  %v1639_v61 = vld [vmem:[#allocation3 + $0x58] sm:$0xff]  ;;  %v1638_v10 = vld [vmem:[#allocation3 + $0x50] sm:$0xff] }
 0x4e3   :  { %1625 = vst [vmem:[#allocation3 + $0x90] sm:$0xf] %v1621_v4  ;;  %1626 = vst [vmem:[#allocation3 + $0x98] sm:$0xf] %v1622_v25  ;;  %1702 = vmatprep.subr.bf16.mxu1 %v1639_v61 }
 0x4e4   :  { %1703 = vmatpush1.bf16.msra.mxu1 %v1638_v10 }
 0x4e5   :  { %v1278_v35 = vpop.permute.xlu1 %1277 }
 0x4e6   :  { %v1283_v0 = vsel %vm143_vm2, %v1278_v35, %v2778_v28  ;;  %v1643_v46 = vld [vmem:[#allocation3 + $0x78] sm:$0xff]  ;;  %v1642_v63 = vld [vmem:[#allocation3 + $0x70] sm:$0xff] }
 0x4e7   :  { %1287 = vst [vmem:[#allocation3 + $0x80] sm:$0xf] %v1283_v0  ;;  %1704 = vmatprep.subr.bf16.mxu1 %v1643_v46 }
 0x4e8   :  { %1705 = vmatpush1.bf16.msra.mxu1 %v1642_v63 }
 0x4ea   :  { %v1647_v60 = vld [vmem:[#allocation3 + $0x98] sm:$0xff]  ;;  %v1646_v48 = vld [vmem:[#allocation3 + $0x90] sm:$0xff] }
 0x4eb   :  { %1706 = vmatprep.subr.bf16.mxu1 %v1647_v60 }
 0x4ec   :  { %1707 = vmatpush1.bf16.msra.mxu1 %v1646_v48 }
 0x4ee   :  { %v1644_v16 = vld [vmem:[#allocation3 + $0x80] sm:$0xff] }
 0x4ef   :  { %1666 = vmatpush1.bf16.msra.mxu0 %v1644_v16  ;;  %1812 = vmatmul.mubr.msk.bf16.vlgmr.msra.gmra.mrb[4].mxu1 %vm855_vm11, %v1627_v30 }
 0x4f2   :  { %1811 = vmatmul.mubr.msk.bf16.vlgmr.msra.gmra.mrb[4].mxu0 %vm855_vm11, %v1627_v30 }
 0x4f6   :  { %v1652_v28 = vpop.permute.xlu1 %1651 }
 0x5c2   :  { %v1732_v41 = vpop.f32.mrb[4].mxu1 }
 0x5c3   :  { %v1733_v52 = vadd.f32 %v1732_v41, %v1652_v28  ;;  %v1734_v36 = vpop.f32.mrb[5].mxu1 }
 0x5c4   :  { %v1735_v3 = vadd.f32 %v1734_v36, %v1652_v28  ;;  %v1736_v13 = vpop.f32.mrb[6].mxu1 }
 0x5c5   :  { %v1741_v55 = vmul.f32 0.70710677, %v1733_v52  ;;  %v1691_v44 = vpop.f32.mrb[4].mxu0  ;;  %v1737_v49 = vpop.f32.mrb[7].mxu1 }
 0x5c6   :  { %v1742_v9 = vmul.f32 0.70710677, %v1735_v3  ;;  %v1692_v12 = vadd.f32 %v1691_v44, %v1652_v28  ;;  %v1693_v6 = vpop.f32.mrb[5].mxu0 }
 0x5c7   :  { %1813 = vst [vmem:[%s2843_s9 + $0x10] sm:$0xff] %v1741_v55  ;;  %v1694_v45 = vadd.f32 %v1693_v6, %v1652_v28  ;;  %v1695_v17 = vpop.f32.mrb[6].mxu0 }
 0x5c8   :  { %1814 = vst [vmem:[%s2843_s9 + $0x18] sm:$0xff] %v1742_v9  ;;  %v1739_v56 = vmul.f32 0.70710677, %v1692_v12  ;;  %v1696_v21 = vpop.f32.mrb[7].mxu0 }
 0x5c9   :  { %v1740_v27 = vmul.f32 0.70710677, %v1694_v45 }
 0x5ca   :  { %1743 = vst [vmem:[%s2843_s9] sm:$0xff] %v1739_v56 }
 0x5cb   :  { %1744 = vst [vmem:[%s2843_s9 + $0x8] sm:$0xff] %v1740_v27 }

</bundles_post_ra>
